<compile_context>
chip_gen: v6e
topology: v6e:2x2x1
jax: 0.10.0
libtpu: 0.0.40
codegen_flags: <defaults>
</compile_context>

<pallas_src>
import math

import jax
import jax.numpy as jnp
from jax import lax
from jax.experimental import pallas as pl
from jax.experimental.pallas import tpu as pltpu

# ---- module hyper-parameters (defaults of Actor_att, with_action=False) ----
NUM_OUTPUTS = 5
N_GOOD = 3
N_FOOD = 3
NUM_UNITS = 32
NUM_TEST = NUM_UNITS // 2                       # 16
IN_DIM = 2 + 2 * N_FOOD + 2 * (N_GOOD - 1)      # 12
LN_EPS = 1e-5
LEAKY_SLOPE = 0.01
INV_SQRT_D = 1.0 / math.sqrt(NUM_TEST)

# fused-layer geometry: blocks = [self, food0, food1, food2, other0, other1]
N_BLOCKS = 1 + N_FOOD + (N_GOOD - 1)            # 6
K1 = NUM_UNITS * N_BLOCKS                       # 192  (hidden of fused layer-1)
K2 = NUM_TEST * N_BLOCKS                        # 96   (features of fused layer-2)
F_PAD = 128                                     # K2 padded to lane width (aligned transpose)

# offsets inside the packed column-parameter slab [BCOL_ROWS, 1]
BM1_OFF = 0
BM2_OFF = BM1_OFF + NUM_UNITS                   # 32
BM3_OFF = BM2_OFF + NUM_UNITS                   # 64
FG_OFF = 72                                     # 64 + 5 (+3 pad to 8-aligned)
FB_OFF = FG_OFF + NUM_TEST                      # 88
OG_OFF = FB_OFF + NUM_TEST                      # 104
OB_OFF = OG_OFF + NUM_TEST                      # 120
BCOL_ROWS = OB_OFF + NUM_TEST                   # 136


def _relu(v):
    return jnp.maximum(v, 0.0)


def _leaky_relu(v):
    return jnp.where(v >= 0.0, v, LEAKY_SLOPE * v)


def _round_up(v, m):
    return -(-v // m) * m


# --------------------------------------------------------------------------
# kernel
# --------------------------------------------------------------------------
def actor_att_kernel(x_ref, w1t_ref, w2t_ref, wm1_ref, wm2_ref, wm3_ref,
                     brow_ref, bcol_ref, out_ref):
    # x: [TB, 12] (natural layout, no wrapper transpose / no padding pass)
    x = x_ref[...].astype(jnp.float32)

    b1 = brow_ref[0:1, :]                      # [1, 192]
    b2 = brow_ref[1:2, 0:F_PAD]                # [1, 128]

    # fused first layers (self + 3 food + 2 other) -> one MXU matmul, K=12
    h = _relu(jnp.dot(x, w1t_ref[...], preferred_element_type=jnp.float32) + b1)   # [TB, 192]
    # fused second layers (block-diagonal) -> one MXU matmul, K=192
    ft = _relu(jnp.dot(h, w2t_ref[...], preferred_element_type=jnp.float32) + b2)  # [TB, 128]

    # single aligned transpose: batch moves onto lanes for everything below
    f = jnp.transpose(ft)                       # [128, TB]; rows 96:128 are zero padding

    self_out = f[0:NUM_TEST, :]                 # [16, TB]

    def entity_branch(base_row, n_ent, gamma, beta):
        feats, scores = [], []
        for e in range(n_ent):
            fe = f[base_row + e * NUM_TEST: base_row + (e + 1) * NUM_TEST, :]       # [16, TB]
            feats.append(fe)
            # (self_out . fe) per batch column: sublane reduction over 16 rows
            scores.append(jnp.sum(self_out * fe, axis=0, keepdims=True) * INV_SQRT_D)

        # softmax over the small, unrolled entity axis ([1, TB] VPU ops)
        m = scores[0]
        for s in scores[1:]:
            m = jnp.maximum(m, s)
        exps = [jnp.exp(s - m) for s in scores]
        denom = exps[0]
        for v in exps[1:]:
            denom = denom + v
        inv = 1.0 / denom

        agg = (exps[0] * inv) * feats[0]
        for e in range(1, n_ent):
            agg = agg + (exps[e] * inv) * feats[e]                                  # [16, TB]

        # LayerNorm over the 16-feature (sublane) axis
        mean = jnp.mean(agg, axis=0, keepdims=True)
        var = jnp.mean((agg - mean) ** 2, axis=0, keepdims=True)
        nrm = (agg - mean) * lax.rsqrt(var + LN_EPS)
        return _relu(nrm * gamma + beta)

    food_out = entity_branch(NUM_TEST, N_FOOD,
                             bcol_ref[FG_OFF:FG_OFF + NUM_TEST, :],
                             bcol_ref[FB_OFF:FB_OFF + NUM_TEST, :])
    other_out = entity_branch(NUM_TEST * (1 + N_FOOD), N_GOOD - 1,
                              bcol_ref[OG_OFF:OG_OFF + NUM_TEST, :],
                              bcol_ref[OB_OFF:OB_OFF + NUM_TEST, :])

    # merge MLP (weights as lhs, batch stays on lanes)
    merged = jnp.concatenate([self_out, food_out, other_out], axis=0)               # [48, TB]
    m1 = _leaky_relu(jnp.dot(wm1_ref[...], merged, preferred_element_type=jnp.float32)
                     + bcol_ref[BM1_OFF:BM1_OFF + NUM_UNITS, :])
    m2 = _leaky_relu(jnp.dot(wm2_ref[...], m1, preferred_element_type=jnp.float32)
                     + bcol_ref[BM2_OFF:BM2_OFF + NUM_UNITS, :])
    out = (jnp.dot(wm3_ref[...], m2, preferred_element_type=jnp.float32)
           + bcol_ref[BM3_OFF:BM3_OFF + NUM_OUTPUTS, :])                            # [5, TB]
    out_ref[...] = out.astype(out_ref.dtype)                                        # lane-dense store


# --------------------------------------------------------------------------
# parameters
# --------------------------------------------------------------------------
def init_params(key):
    """Deterministic synthetic parameters in PyTorch layout ([out, in] weights,
    [out, 1] biases / LayerNorm params)."""
    ks = jax.random.split(key, 9)
    s = 0.1

    def lin(k, fan_in, fan_out):
        kw, kb = jax.random.split(k)
        w = jax.random.normal(kw, (fan_out, fan_in), jnp.float32) * s
        b = jax.random.normal(kb, (fan_out, 1), jnp.float32) * s
        return w, b

    ws1, bs1 = lin(ks[0], 2, NUM_UNITS)
    ws2, bs2 = lin(ks[1], NUM_UNITS, NUM_TEST)
    wf1, bf1 = lin(ks[2], 2, NUM_UNITS)
    wf2, bf2 = lin(ks[3], NUM_UNITS, NUM_TEST)
    wo1, bo1 = lin(ks[4], 2, NUM_UNITS)
    wo2, bo2 = lin(ks[5], NUM_UNITS, NUM_TEST)
    wm1, bm1 = lin(ks[6], NUM_TEST * 3, NUM_UNITS)
    wm2, bm2 = lin(ks[7], NUM_UNITS, NUM_UNITS)
    wm3, bm3 = lin(ks[8], NUM_UNITS, NUM_OUTPUTS)
    fg = jnp.ones((NUM_TEST, 1), jnp.float32)
    fb = jnp.zeros((NUM_TEST, 1), jnp.float32)
    og = jnp.ones((NUM_TEST, 1), jnp.float32)
    ob = jnp.zeros((NUM_TEST, 1), jnp.float32)

    return (ws1, bs1, ws2, bs2,
            wf1, bf1, wf2, bf2, fg, fb,
            wo1, bo1, wo2, bo2, og, ob,
            wm1, bm1, wm2, bm2, wm3, bm3)


def pack_params(params):
    """Pack the 22 PyTorch-layout params into 7 kernel slabs (trace-time only)."""
    (ws1, bs1, ws2, bs2,
     wf1, bf1, wf2, bf2, fg, fb,
     wo1, bo1, wo2, bo2, og, ob,
     wm1, bm1, wm2, bm2, wm3, bm3) = params

    # block k: (layer-1 W [32,2], b, layer-2 W [16,32], b, first input column)
    blocks = [(ws1, bs1, ws2, bs2, 0)]
    for e in range(N_FOOD):
        blocks.append((wf1, bf1, wf2, bf2, 2 + 2 * e))
    for e in range(N_GOOD - 1):
        blocks.append((wo1, bo1, wo2, bo2, 2 + 2 * N_FOOD + 2 * e))

    w1t = jnp.zeros((IN_DIM, K1), jnp.float32)          # block-structured
    b1r = jnp.zeros((1, K1), jnp.float32)
    w2t = jnp.zeros((K1, F_PAD), jnp.float32)            # block-diagonal, lane-padded
    b2r = jnp.zeros((1, F_PAD), jnp.float32)
    for k, (w1, b1, w2, b2, c0) in enumerate(blocks):
        w1t = w1t.at[c0:c0 + 2, k * NUM_UNITS:(k + 1) * NUM_UNITS].set(w1.T)
        b1r = b1r.at[0, k * NUM_UNITS:(k + 1) * NUM_UNITS].set(b1[:, 0])
        w2t = w2t.at[k * NUM_UNITS:(k + 1) * NUM_UNITS,
                     k * NUM_TEST:(k + 1) * NUM_TEST].set(w2.T)
        b2r = b2r.at[0, k * NUM_TEST:(k + 1) * NUM_TEST].set(b2[:, 0])

    brow = jnp.concatenate(
        [b1r, jnp.pad(b2r, ((0, 0), (0, K1 - F_PAD)))], axis=0)          # [2, 192]
    bcol = jnp.concatenate(
        [bm1, bm2, bm3, jnp.zeros((3, 1), jnp.float32),
         fg, fb, og, ob], axis=0)                                         # [136, 1]

    return (w1t, w2t, wm1, wm2, wm3, brow, bcol)


# --------------------------------------------------------------------------
# wrapper
# --------------------------------------------------------------------------
def actor_att_forward(x, packed, *, tile_batch=2048, input_dtype=None):
    """x: [B, IN_DIM] -> [B, NUM_OUTPUTS].

    tile_batch: batch tile (lanes per grid step).  Default 2048; use ~1024 on
    v5e (single vst slot / smaller MXU).  `input_dtype=jnp.bfloat16` halves
    input HBM traffic on v6e/v7x (kernel upcasts to f32 right after load).
    """
    B = x.shape[0]
    tile_batch = max(128, (int(tile_batch) // 128) * 128)
    # multiple of 128; cap so the grid has >=2 steps (v7x megacore) when B allows
    TB = max(128, min(tile_batch, _round_up(pl.cdiv(B, 2), 128)))
    Bp = TB if B < TB else B                  # pad only tiny batches; large B uses a partial final block
    grid = (pl.cdiv(Bp, TB),)

    if input_dtype is not None:
        x = x.astype(input_dtype)
    if Bp != B:
        x = jnp.pad(x, ((0, Bp - B), (0, 0)))  # only for B < 128; zero rows are benign

    (w1t, w2t, wm1, wm2, wm3, brow, bcol) = packed

    def const_spec(a):
        return pl.BlockSpec(a.shape, lambda i: (0,) * a.ndim)

    in_specs = [pl.BlockSpec((TB, IN_DIM), lambda i: (i, 0))]
    in_specs += [const_spec(a) for a in packed]
    out_spec = pl.BlockSpec((NUM_OUTPUTS, TB), lambda i: (0, i))

    param_bytes = sum(int(a.size) * a.dtype.itemsize for a in packed)
    flops_per_row = 2 * (IN_DIM * K1 + K1 * F_PAD
                         + 3 * NUM_TEST * NUM_UNITS + NUM_UNITS * NUM_UNITS
                         + NUM_UNITS * NUM_OUTPUTS)
    cost = pl.CostEstimate(
        flops=int(flops_per_row * Bp),
        transcendentals=int((N_FOOD + (N_GOOD - 1)) * Bp),
        bytes_accessed=int((IN_DIM * x.dtype.itemsize + NUM_OUTPUTS * 4) * Bp + param_bytes),
    )

    out_t = pl.pallas_call(
        actor_att_kernel,
        out_shape=jax.ShapeDtypeStruct((NUM_OUTPUTS, Bp), jnp.float32),
        grid=grid,
        in_specs=in_specs,
        out_specs=out_spec,
        compiler_params=pltpu.CompilerParams(
            dimension_semantics=("parallel",),   # megacore sharding on v7x
        ),
        cost_estimate=cost,
    )(x, *packed)

    # remaining relayout is output-only (5 floats/row), ~40% of the input bytes
    return jnp.transpose(out_t[:, :B])


# ---------------- pure-JAX reference (for correctness check) ----------------
def actor_att_reference(x, params):
    (ws1, bs1, ws2, bs2,
     wf1, bf1, wf2, bf2, fg, fb,
     wo1, bo1, wo2, bo2, og, ob,
     wm1, bm1, wm2, bm2, wm3, bm3) = params
    hp = dict(precision=jax.lax.Precision.HIGHEST)

    def lin(v, w, b):                    # v [B, in], w [out, in], b [out, 1]
        return jnp.dot(v, w.T, **hp) + b[:, 0][None, :]

    relu = lambda v: jnp.maximum(v, 0.0)
    lrelu = lambda v: jnp.where(v >= 0.0, v, LEAKY_SLOPE * v)

    self_out = relu(lin(relu(lin(x[:, 0:2], ws1, bs1)), ws2, bs2))

    def branch(off, n, w1, b1, w2, b2, g, bt):
        feats = [relu(lin(relu(lin(x[:, off + 2 * e: off + 2 * e + 2], w1, b1)), w2, b2))
                 for e in range(n)]
        f = jnp.stack(feats, axis=2)                                   # [B, 16, n]
        s = jnp.einsum('bf,bfn->bn', self_out, f, **hp) * INV_SQRT_D
        p = jax.nn.softmax(s, axis=1)
        agg = jnp.einsum('bn,bfn->bf', p, f, **hp)
        mean = agg.mean(axis=1, keepdims=True)
        var = ((agg - mean) ** 2).mean(axis=1, keepdims=True)
        nrm = (agg - mean) * jax.lax.rsqrt(var + LN_EPS)
        return relu(nrm * g[:, 0][None, :] + bt[:, 0][None, :])

    food = branch(2, N_FOOD, wf1, bf1, wf2, bf2, fg, fb)
    other = branch(2 + 2 * N_FOOD, N_GOOD - 1, wo1, bo1, wo2, bo2, og, ob)
    merged = jnp.concatenate([self_out, food, other], axis=1)
    m1 = lrelu(lin(merged, wm1, bm1))
    m2 = lrelu(lin(m1, wm2, bm2))
    return lin(m2, wm3, bm3)


if __name__ == "__main__":
    key = jax.random.PRNGKey(0)
    k_x, k_p = jax.random.split(key)

    params = init_params(k_p)
    packed = pack_params(params)

    # small batch (single grid step, padded-tile path)
    batch = 8
    x = jax.random.normal(k_x, (batch, IN_DIM), jnp.float32)
    out = actor_att_forward(x, packed)
    jax.block_until_ready(out)
    assert out.shape == (batch, NUM_OUTPUTS)
    ref = actor_att_reference(x, params)
    max_err = float(jnp.max(jnp.abs(out - ref)))
    assert max_err < 2e-3, f"mismatch vs reference (B=8): {max_err}"

    # multi-step grid with a partial final block (exercises masked writes)
    batch2 = 384
    x2 = jax.random.normal(jax.random.fold_in(k_x, 1), (batch2, IN_DIM), jnp.float32)
    out2 = actor_att_forward(x2, packed)
    jax.block_until_ready(out2)
    ref2 = actor_att_reference(x2, params)
    max_err2 = float(jnp.max(jnp.abs(out2 - ref2)))
    assert max_err2 < 2e-3, f"mismatch vs reference (B=384): {max_err2}"

    print("KERNEL_OK")
</pallas_src>

<mosaic_0001>
module attributes {stable_mosaic.version = 11 : i64} {
  func.func @actor_att_kernel(%arg0: i32, %arg1: memref<128x12xf32, #tpu.memory_space<vmem>>, %arg2: memref<12x192xf32, #tpu.memory_space<vmem>>, %arg3: memref<192x128xf32, #tpu.memory_space<vmem>>, %arg4: memref<32x48xf32, #tpu.memory_space<vmem>>, %arg5: memref<32x32xf32, #tpu.memory_space<vmem>>, %arg6: memref<5x32xf32, #tpu.memory_space<vmem>>, %arg7: memref<2x192xf32, #tpu.memory_space<vmem>>, %arg8: memref<136x1xf32, #tpu.memory_space<vmem>>, %arg9: memref<5x128xf32, #tpu.memory_space<vmem>>) attributes {dimension_semantics = [#tpu.dimension_semantics<parallel>], iteration_bounds = array<i64: 1>, scalar_prefetch = 0 : i64, scratch_operands = 0 : i64, tpu.core_type = #tpu.core_type<tc>, window_params = [{transform_indices = @transform_0, window_bounds = array<i64: 128, 12>}, {pipeline_mode = #tpu.pipeline_mode<synchronous>, transform_indices = @transform_1, window_bounds = array<i64: 12, 192>}, {pipeline_mode = #tpu.pipeline_mode<synchronous>, transform_indices = @transform_2, window_bounds = array<i64: 192, 128>}, {pipeline_mode = #tpu.pipeline_mode<synchronous>, transform_indices = @transform_3, window_bounds = array<i64: 32, 48>}, {pipeline_mode = #tpu.pipeline_mode<synchronous>, transform_indices = @transform_4, window_bounds = array<i64: 32, 32>}, {pipeline_mode = #tpu.pipeline_mode<synchronous>, transform_indices = @transform_5, window_bounds = array<i64: 5, 32>}, {pipeline_mode = #tpu.pipeline_mode<synchronous>, transform_indices = @transform_6, window_bounds = array<i64: 2, 192>}, {pipeline_mode = #tpu.pipeline_mode<synchronous>, transform_indices = @transform_7, window_bounds = array<i64: 136, 1>}, {transform_indices = @transform_8, window_bounds = array<i64: 5, 128>}]} {
    %c0 = arith.constant 0 : index
    %c0_0 = arith.constant 0 : index
    %0 = vector.load %arg1[%c0, %c0_0] : memref<128x12xf32, #tpu.memory_space<vmem>>, vector<128x12xf32>
    %c0_1 = arith.constant 0 : index
    %c0_2 = arith.constant 0 : index
    %1 = vector.load %arg7[%c0_1, %c0_2] : memref<2x192xf32, #tpu.memory_space<vmem>>, vector<1x192xf32>
    %c1 = arith.constant 1 : index
    %c0_3 = arith.constant 0 : index
    %2 = vector.load %arg7[%c1, %c0_3] : memref<2x192xf32, #tpu.memory_space<vmem>>, vector<1x128xf32>
    %c0_4 = arith.constant 0 : index
    %c0_5 = arith.constant 0 : index
    %3 = vector.load %arg2[%c0_4, %c0_5] : memref<12x192xf32, #tpu.memory_space<vmem>>, vector<12x192xf32>
    %cst = arith.constant dense<0.000000e+00> : vector<128x192xf32>
    %4 = tpu.matmul %0, %3, %cst {dimension_numbers = #tpu.dot_dimension_numbers<[1], [0], [0], [1], [0, 0, 1, 1], [], []>} : vector<128x12xf32>, vector<12x192xf32>, vector<128x192xf32> -> vector<128x192xf32>
    %5 = vector.broadcast %1 : vector<1x192xf32> to vector<128x192xf32>
    %6 = arith.addf %4, %5 : vector<128x192xf32>
    %cst_6 = arith.constant 0.000000e+00 : f32
    %7 = vector.broadcast %cst_6 : f32 to vector<128x192xf32>
    %8 = arith.maximumf %6, %7 : vector<128x192xf32>
    %c0_7 = arith.constant 0 : index
    %c0_8 = arith.constant 0 : index
    %9 = vector.load %arg3[%c0_7, %c0_8] : memref<192x128xf32, #tpu.memory_space<vmem>>, vector<192x128xf32>
    %cst_9 = arith.constant dense<0.000000e+00> : vector<128x128xf32>
    %10 = tpu.matmul %8, %9, %cst_9 {dimension_numbers = #tpu.dot_dimension_numbers<[1], [0], [0], [1], [0, 0, 1, 1], [], []>} : vector<128x192xf32>, vector<192x128xf32>, vector<128x128xf32> -> vector<128x128xf32>
    %11 = vector.broadcast %2 : vector<1x128xf32> to vector<128x128xf32>
    %12 = arith.addf %10, %11 : vector<128x128xf32>
    %cst_10 = arith.constant 0.000000e+00 : f32
    %13 = vector.broadcast %cst_10 : f32 to vector<128x128xf32>
    %14 = arith.maximumf %12, %13 : vector<128x128xf32>
    %15 = tpu.transpose %14, [1, 0] : vector<128x128xf32> -> vector<128x128xf32>
    %16 = vector.extract_strided_slice %15 {offsets = [0, 0], sizes = [16, 128], strides = [1, 1]} : vector<128x128xf32> to vector<16x128xf32>
    %c72 = arith.constant 72 : index
    %c0_11 = arith.constant 0 : index
    %17 = vector.load %arg8[%c72, %c0_11] : memref<136x1xf32, #tpu.memory_space<vmem>>, vector<16x1xf32>
    %c88 = arith.constant 88 : index
    %c0_12 = arith.constant 0 : index
    %18 = vector.load %arg8[%c88, %c0_12] : memref<136x1xf32, #tpu.memory_space<vmem>>, vector<16x1xf32>
    %19 = vector.extract_strided_slice %15 {offsets = [16, 0], sizes = [16, 128], strides = [1, 1]} : vector<128x128xf32> to vector<16x128xf32>
    %20 = arith.mulf %16, %19 : vector<16x128xf32>
    %cst_13 = arith.constant dense<0.000000e+00> : vector<128xf32>
    %21 = vector.multi_reduction <add>, %20, %cst_13 [0] : vector<16x128xf32> to vector<128xf32>
    %22 = vector.shape_cast %21 : vector<128xf32> to vector<1x128xf32>
    %cst_14 = arith.constant 2.500000e-01 : f32
    %23 = vector.broadcast %cst_14 : f32 to vector<1x128xf32>
    %24 = arith.mulf %22, %23 : vector<1x128xf32>
    %25 = vector.extract_strided_slice %15 {offsets = [32, 0], sizes = [16, 128], strides = [1, 1]} : vector<128x128xf32> to vector<16x128xf32>
    %26 = arith.mulf %16, %25 : vector<16x128xf32>
    %cst_15 = arith.constant dense<0.000000e+00> : vector<128xf32>
    %27 = vector.multi_reduction <add>, %26, %cst_15 [0] : vector<16x128xf32> to vector<128xf32>
    %28 = vector.shape_cast %27 : vector<128xf32> to vector<1x128xf32>
    %cst_16 = arith.constant 2.500000e-01 : f32
    %29 = vector.broadcast %cst_16 : f32 to vector<1x128xf32>
    %30 = arith.mulf %28, %29 : vector<1x128xf32>
    %31 = vector.extract_strided_slice %15 {offsets = [48, 0], sizes = [16, 128], strides = [1, 1]} : vector<128x128xf32> to vector<16x128xf32>
    %32 = arith.mulf %16, %31 : vector<16x128xf32>
    %cst_17 = arith.constant dense<0.000000e+00> : vector<128xf32>
    %33 = vector.multi_reduction <add>, %32, %cst_17 [0] : vector<16x128xf32> to vector<128xf32>
    %34 = vector.shape_cast %33 : vector<128xf32> to vector<1x128xf32>
    %cst_18 = arith.constant 2.500000e-01 : f32
    %35 = vector.broadcast %cst_18 : f32 to vector<1x128xf32>
    %36 = arith.mulf %34, %35 : vector<1x128xf32>
    %37 = arith.maximumf %24, %30 : vector<1x128xf32>
    %38 = arith.maximumf %37, %36 : vector<1x128xf32>
    %39 = arith.subf %24, %38 : vector<1x128xf32>
    %40 = math.exp %39 : vector<1x128xf32>
    %41 = arith.subf %30, %38 : vector<1x128xf32>
    %42 = math.exp %41 : vector<1x128xf32>
    %43 = arith.subf %36, %38 : vector<1x128xf32>
    %44 = math.exp %43 : vector<1x128xf32>
    %45 = arith.addf %40, %42 : vector<1x128xf32>
    %46 = arith.addf %45, %44 : vector<1x128xf32>
    %cst_19 = arith.constant 1.000000e+00 : f32
    %47 = vector.broadcast %cst_19 : f32 to vector<1x128xf32>
    %48 = arith.divf %47, %46 : vector<1x128xf32>
    %49 = arith.mulf %40, %48 : vector<1x128xf32>
    %50 = vector.broadcast %49 : vector<1x128xf32> to vector<16x128xf32>
    %51 = arith.mulf %50, %19 : vector<16x128xf32>
    %52 = arith.mulf %42, %48 : vector<1x128xf32>
    %53 = vector.broadcast %52 : vector<1x128xf32> to vector<16x128xf32>
    %54 = arith.mulf %53, %25 : vector<16x128xf32>
    %55 = arith.addf %51, %54 : vector<16x128xf32>
    %56 = arith.mulf %44, %48 : vector<1x128xf32>
    %57 = vector.broadcast %56 : vector<1x128xf32> to vector<16x128xf32>
    %58 = arith.mulf %57, %31 : vector<16x128xf32>
    %59 = arith.addf %55, %58 : vector<16x128xf32>
    %cst_20 = arith.constant dense<0.000000e+00> : vector<128xf32>
    %60 = vector.multi_reduction <add>, %59, %cst_20 [0] : vector<16x128xf32> to vector<128xf32>
    %61 = vector.shape_cast %60 : vector<128xf32> to vector<1x128xf32>
    %cst_21 = arith.constant 1.600000e+01 : f32
    %62 = vector.broadcast %cst_21 : f32 to vector<1x128xf32>
    %63 = arith.divf %61, %62 : vector<1x128xf32>
    %64 = vector.broadcast %63 : vector<1x128xf32> to vector<16x128xf32>
    %65 = arith.subf %59, %64 : vector<16x128xf32>
    %66 = arith.mulf %65, %65 : vector<16x128xf32>
    %cst_22 = arith.constant dense<0.000000e+00> : vector<128xf32>
    %67 = vector.multi_reduction <add>, %66, %cst_22 [0] : vector<16x128xf32> to vector<128xf32>
    %68 = vector.shape_cast %67 : vector<128xf32> to vector<1x128xf32>
    %cst_23 = arith.constant 1.600000e+01 : f32
    %69 = vector.broadcast %cst_23 : f32 to vector<1x128xf32>
    %70 = arith.divf %68, %69 : vector<1x128xf32>
    %71 = vector.broadcast %63 : vector<1x128xf32> to vector<16x128xf32>
    %72 = arith.subf %59, %71 : vector<16x128xf32>
    %cst_24 = arith.constant 9.99999974E-6 : f32
    %73 = vector.broadcast %cst_24 : f32 to vector<1x128xf32>
    %74 = arith.addf %70, %73 : vector<1x128xf32>
    %75 = math.rsqrt %74 : vector<1x128xf32>
    %76 = vector.broadcast %75 : vector<1x128xf32> to vector<16x128xf32>
    %77 = arith.mulf %72, %76 : vector<16x128xf32>
    %78 = vector.broadcast %17 : vector<16x1xf32> to vector<16x128xf32>
    %79 = arith.mulf %77, %78 : vector<16x128xf32>
    %80 = vector.broadcast %18 : vector<16x1xf32> to vector<16x128xf32>
    %81 = arith.addf %79, %80 : vector<16x128xf32>
    %cst_25 = arith.constant 0.000000e+00 : f32
    %82 = vector.broadcast %cst_25 : f32 to vector<16x128xf32>
    %83 = arith.maximumf %81, %82 : vector<16x128xf32>
    %c104 = arith.constant 104 : index
    %c0_26 = arith.constant 0 : index
    %84 = vector.load %arg8[%c104, %c0_26] : memref<136x1xf32, #tpu.memory_space<vmem>>, vector<16x1xf32>
    %c120 = arith.constant 120 : index
    %c0_27 = arith.constant 0 : index
    %85 = vector.load %arg8[%c120, %c0_27] : memref<136x1xf32, #tpu.memory_space<vmem>>, vector<16x1xf32>
    %86 = vector.extract_strided_slice %15 {offsets = [64, 0], sizes = [16, 128], strides = [1, 1]} : vector<128x128xf32> to vector<16x128xf32>
    %87 = arith.mulf %16, %86 : vector<16x128xf32>
    %cst_28 = arith.constant dense<0.000000e+00> : vector<128xf32>
    %88 = vector.multi_reduction <add>, %87, %cst_28 [0] : vector<16x128xf32> to vector<128xf32>
    %89 = vector.shape_cast %88 : vector<128xf32> to vector<1x128xf32>
    %cst_29 = arith.constant 2.500000e-01 : f32
    %90 = vector.broadcast %cst_29 : f32 to vector<1x128xf32>
    %91 = arith.mulf %89, %90 : vector<1x128xf32>
    %92 = vector.extract_strided_slice %15 {offsets = [80, 0], sizes = [16, 128], strides = [1, 1]} : vector<128x128xf32> to vector<16x128xf32>
    %93 = arith.mulf %16, %92 : vector<16x128xf32>
    %cst_30 = arith.constant dense<0.000000e+00> : vector<128xf32>
    %94 = vector.multi_reduction <add>, %93, %cst_30 [0] : vector<16x128xf32> to vector<128xf32>
    %95 = vector.shape_cast %94 : vector<128xf32> to vector<1x128xf32>
    %cst_31 = arith.constant 2.500000e-01 : f32
    %96 = vector.broadcast %cst_31 : f32 to vector<1x128xf32>
    %97 = arith.mulf %95, %96 : vector<1x128xf32>
    %98 = arith.maximumf %91, %97 : vector<1x128xf32>
    %99 = arith.subf %91, %98 : vector<1x128xf32>
    %100 = math.exp %99 : vector<1x128xf32>
    %101 = arith.subf %97, %98 : vector<1x128xf32>
    %102 = math.exp %101 : vector<1x128xf32>
    %103 = arith.addf %100, %102 : vector<1x128xf32>
    %cst_32 = arith.constant 1.000000e+00 : f32
    %104 = vector.broadcast %cst_32 : f32 to vector<1x128xf32>
    %105 = arith.divf %104, %103 : vector<1x128xf32>
    %106 = arith.mulf %100, %105 : vector<1x128xf32>
    %107 = vector.broadcast %106 : vector<1x128xf32> to vector<16x128xf32>
    %108 = arith.mulf %107, %86 : vector<16x128xf32>
    %109 = arith.mulf %102, %105 : vector<1x128xf32>
    %110 = vector.broadcast %109 : vector<1x128xf32> to vector<16x128xf32>
    %111 = arith.mulf %110, %92 : vector<16x128xf32>
    %112 = arith.addf %108, %111 : vector<16x128xf32>
    %cst_33 = arith.constant dense<0.000000e+00> : vector<128xf32>
    %113 = vector.multi_reduction <add>, %112, %cst_33 [0] : vector<16x128xf32> to vector<128xf32>
    %114 = vector.shape_cast %113 : vector<128xf32> to vector<1x128xf32>
    %cst_34 = arith.constant 1.600000e+01 : f32
    %115 = vector.broadcast %cst_34 : f32 to vector<1x128xf32>
    %116 = arith.divf %114, %115 : vector<1x128xf32>
    %117 = vector.broadcast %116 : vector<1x128xf32> to vector<16x128xf32>
    %118 = arith.subf %112, %117 : vector<16x128xf32>
    %119 = arith.mulf %118, %118 : vector<16x128xf32>
    %cst_35 = arith.constant dense<0.000000e+00> : vector<128xf32>
    %120 = vector.multi_reduction <add>, %119, %cst_35 [0] : vector<16x128xf32> to vector<128xf32>
    %121 = vector.shape_cast %120 : vector<128xf32> to vector<1x128xf32>
    %cst_36 = arith.constant 1.600000e+01 : f32
    %122 = vector.broadcast %cst_36 : f32 to vector<1x128xf32>
    %123 = arith.divf %121, %122 : vector<1x128xf32>
    %124 = vector.broadcast %116 : vector<1x128xf32> to vector<16x128xf32>
    %125 = arith.subf %112, %124 : vector<16x128xf32>
    %cst_37 = arith.constant 9.99999974E-6 : f32
    %126 = vector.broadcast %cst_37 : f32 to vector<1x128xf32>
    %127 = arith.addf %123, %126 : vector<1x128xf32>
    %128 = math.rsqrt %127 : vector<1x128xf32>
    %129 = vector.broadcast %128 : vector<1x128xf32> to vector<16x128xf32>
    %130 = arith.mulf %125, %129 : vector<16x128xf32>
    %131 = vector.broadcast %84 : vector<16x1xf32> to vector<16x128xf32>
    %132 = arith.mulf %130, %131 : vector<16x128xf32>
    %133 = vector.broadcast %85 : vector<16x1xf32> to vector<16x128xf32>
    %134 = arith.addf %132, %133 : vector<16x128xf32>
    %cst_38 = arith.constant 0.000000e+00 : f32
    %135 = vector.broadcast %cst_38 : f32 to vector<16x128xf32>
    %136 = arith.maximumf %134, %135 : vector<16x128xf32>
    %137 = tpu.concatenate %16, %83, %136 in 0 : vector<16x128xf32>, vector<16x128xf32>, vector<16x128xf32> -> vector<48x128xf32>
    %c0_39 = arith.constant 0 : index
    %c0_40 = arith.constant 0 : index
    %138 = vector.load %arg4[%c0_39, %c0_40] : memref<32x48xf32, #tpu.memory_space<vmem>>, vector<32x48xf32>
    %cst_41 = arith.constant dense<0.000000e+00> : vector<32x128xf32>
    %139 = tpu.matmul %138, %137, %cst_41 {dimension_numbers = #tpu.dot_dimension_numbers<[1], [0], [0], [1], [0, 0, 1, 1], [], []>} : vector<32x48xf32>, vector<48x128xf32>, vector<32x128xf32> -> vector<32x128xf32>
    %c0_42 = arith.constant 0 : index
    %c0_43 = arith.constant 0 : index
    %140 = vector.load %arg8[%c0_42, %c0_43] : memref<136x1xf32, #tpu.memory_space<vmem>>, vector<32x1xf32>
    %141 = vector.broadcast %140 : vector<32x1xf32> to vector<32x128xf32>
    %142 = arith.addf %139, %141 : vector<32x128xf32>
    %cst_44 = arith.constant 0.000000e+00 : f32
    %143 = vector.broadcast %cst_44 : f32 to vector<32x128xf32>
    %144 = arith.cmpf oge, %142, %143 : vector<32x128xf32>
    %cst_45 = arith.constant 0.00999999977 : f32
    %145 = vector.broadcast %cst_45 : f32 to vector<32x128xf32>
    %146 = arith.mulf %145, %142 : vector<32x128xf32>
    %147 = arith.select %144, %142, %146 : vector<32x128xi1>, vector<32x128xf32>
    %c0_46 = arith.constant 0 : index
    %c0_47 = arith.constant 0 : index
    %148 = vector.load %arg5[%c0_46, %c0_47] : memref<32x32xf32, #tpu.memory_space<vmem>>, vector<32x32xf32>
    %cst_48 = arith.constant dense<0.000000e+00> : vector<32x128xf32>
    %149 = tpu.matmul %148, %147, %cst_48 {dimension_numbers = #tpu.dot_dimension_numbers<[1], [0], [0], [1], [0, 0, 1, 1], [], []>} : vector<32x32xf32>, vector<32x128xf32>, vector<32x128xf32> -> vector<32x128xf32>
    %c32 = arith.constant 32 : index
    %c0_49 = arith.constant 0 : index
    %150 = vector.load %arg8[%c32, %c0_49] : memref<136x1xf32, #tpu.memory_space<vmem>>, vector<32x1xf32>
    %151 = vector.broadcast %150 : vector<32x1xf32> to vector<32x128xf32>
    %152 = arith.addf %149, %151 : vector<32x128xf32>
    %cst_50 = arith.constant 0.000000e+00 : f32
    %153 = vector.broadcast %cst_50 : f32 to vector<32x128xf32>
    %154 = arith.cmpf oge, %152, %153 : vector<32x128xf32>
    %cst_51 = arith.constant 0.00999999977 : f32
    %155 = vector.broadcast %cst_51 : f32 to vector<32x128xf32>
    %156 = arith.mulf %155, %152 : vector<32x128xf32>
    %157 = arith.select %154, %152, %156 : vector<32x128xi1>, vector<32x128xf32>
    %c0_52 = arith.constant 0 : index
    %c0_53 = arith.constant 0 : index
    %158 = vector.load %arg6[%c0_52, %c0_53] : memref<5x32xf32, #tpu.memory_space<vmem>>, vector<5x32xf32>
    %cst_54 = arith.constant dense<0.000000e+00> : vector<5x128xf32>
    %159 = tpu.matmul %158, %157, %cst_54 {dimension_numbers = #tpu.dot_dimension_numbers<[1], [0], [0], [1], [0, 0, 1, 1], [], []>} : vector<5x32xf32>, vector<32x128xf32>, vector<5x128xf32> -> vector<5x128xf32>
    %c64 = arith.constant 64 : index
    %c0_55 = arith.constant 0 : index
    %160 = vector.load %arg8[%c64, %c0_55] : memref<136x1xf32, #tpu.memory_space<vmem>>, vector<5x1xf32>
    %161 = vector.broadcast %160 : vector<5x1xf32> to vector<5x128xf32>
    %162 = arith.addf %159, %161 : vector<5x128xf32>
    %c0_56 = arith.constant 0 : index
    %c0_57 = arith.constant 0 : index
    %163 = vector.load %arg9[%c0_56, %c0_57] : memref<5x128xf32, #tpu.memory_space<vmem>>, vector<5x128xf32>
    tpu.vector_store %arg9[%c0_56, %c0_57], %162 {strides = array<i32>} : memref<5x128xf32, #tpu.memory_space<vmem>>, vector<5x128xf32>,
    return
  }
  func.func @transform_0(%arg0: i32) -> (i32, i32) {
    %c0_i32 = arith.constant 0 : i32
    %c0_i32_0 = arith.constant 0 : i32
    return %arg0, %c0_i32 : i32, i32
  }
  func.func @transform_1(%arg0: i32) -> (i32, i32) {
    %c0_i32 = arith.constant 0 : i32
    %c0_i32_0 = arith.constant 0 : i32
    %c0_i32_1 = arith.constant 0 : i32
    return %c0_i32, %c0_i32_0 : i32, i32
  }
  func.func @transform_2(%arg0: i32) -> (i32, i32) {
    %c0_i32 = arith.constant 0 : i32
    %c0_i32_0 = arith.constant 0 : i32
    %c0_i32_1 = arith.constant 0 : i32
    return %c0_i32, %c0_i32_0 : i32, i32
  }
  func.func @transform_3(%arg0: i32) -> (i32, i32) {
    %c0_i32 = arith.constant 0 : i32
    %c0_i32_0 = arith.constant 0 : i32
    %c0_i32_1 = arith.constant 0 : i32
    return %c0_i32, %c0_i32_0 : i32, i32
  }
  func.func @transform_4(%arg0: i32) -> (i32, i32) {
    %c0_i32 = arith.constant 0 : i32
    %c0_i32_0 = arith.constant 0 : i32
    %c0_i32_1 = arith.constant 0 : i32
    return %c0_i32, %c0_i32_0 : i32, i32
  }
  func.func @transform_5(%arg0: i32) -> (i32, i32) {
    %c0_i32 = arith.constant 0 : i32
    %c0_i32_0 = arith.constant 0 : i32
    %c0_i32_1 = arith.constant 0 : i32
    return %c0_i32, %c0_i32_0 : i32, i32
  }
  func.func @transform_6(%arg0: i32) -> (i32, i32) {
    %c0_i32 = arith.constant 0 : i32
    %c0_i32_0 = arith.constant 0 : i32
    %c0_i32_1 = arith.constant 0 : i32
    return %c0_i32, %c0_i32_0 : i32, i32
  }
  func.func @transform_7(%arg0: i32) -> (i32, i32) {
    %c0_i32 = arith.constant 0 : i32
    %c0_i32_0 = arith.constant 0 : i32
    %c0_i32_1 = arith.constant 0 : i32
    return %c0_i32, %c0_i32_0 : i32, i32
  }
  func.func @transform_8(%arg0: i32) -> (i32, i32) {
    %c0_i32 = arith.constant 0 : i32
    %c0_i32_0 = arith.constant 0 : i32
    return %c0_i32, %arg0 : i32, i32
  }
}

</mosaic_0001>

<bundles_post_ra>
// kernel: tpu_custom_call.1
= control target key start
LH: loop header
LB: loop body
LE: loop exit
PB: predicated region body
PF: predicated region fallthrough
CT: control target
= control target key end

     0   :  { %13 = vsyncpa [#allocation3], 0  ;;  %s1891_s0 = inlined_call_operand.vmem [shape: f32[128,12], index: 0, kind: input, shape index: {}]   ;;  %s1892_s1 = inlined_call_operand.vmem [shape: f32[12,192], index: 1, kind: input, shape index: {}]   ;;  %s1893_s2 = inlined_call_operand.vmem [shape: f32[192,128], index: 2, kind: input, shape index: {}]   ;;  %s1894_s3 = inlined_call_operand.vmem [shape: f32[32,48], index: 3, kind: input, shape index: {}]   ;;  %s1895_s4 = inlined_call_operand.vmem [shape: f32[32,32], index: 4, kind: input, shape index: {}]   ;;  %s1896_s5 = inlined_call_operand.hbm [shape: f32[5,32], index: 5, kind: input, shape index: {}]   ;;  %s1897_s6 = inlined_call_operand.vmem [shape: f32[2,192], index: 6, kind: input, shape index: {}]   ;;  %s1898_s7 = inlined_call_operand.vmem [shape: f32[136,1], index: 7, kind: input, shape index: {}]   ;;  %s1899_s8 = inlined_call_operand.hbm [shape: f32[5,128], index: 8, kind: output, shape index: {}]  }
   0x1   :  { %14 = vsyncpa [#allocation4], 0  ;;  %s1398_s27 = smov [#allocation2]  }
   0x2   :  { %s31_s28 = sshll.u32 %s1398_s27, 4  ;;  %s32_s28 = int_to_ptr.vmem [resolvable:$true] %s31_s28 }
   0x3   :  { %s1362_s29 = scalar_lea.vmem %s32_s28, 128  ;;  %p1367_p1 = scmp.lt.s32.totalorder %s32_s28, %s32_s28 }
   0x4   :  { %p1363_p0 = scmp.ne.s32.totalorder %s32_s28, %s1362_s29  ;;  %p1368_p2 = scmp.lt.s32.totalorder %s1362_s29, %s1362_s29 }
   0x6   :  { %p1369_p3 = por %p1368_p2, %p1367_p1 }
   0x8   :  { %p1370_p4 = pnand %p1369_p3, %p1363_p0 }
   0xa   :  { %1373 = shalt.err (!%p1370_p4)
}
   0xb   :  { %34 = dma.hbm_to_vmem [thread:$0]  %s1896_s5, 128, %s32_s28, [#allocation3]  }
   0xc   :  { %1394 = dma.done.wait [#allocation3], 128  }
   0xd   :  { %1395 = vsyncadd [#allocation3], 4294967168  ;;  %v1399_v0 = vmov 0.0   ;;  %vm124_vm0 = vcmask 1043456   ;;  %v63_v1 = vld [vmem:[%s1892_s1 + $0x18] sm:$0xf]  ;;  %v65_v45 = vlaneseq }
   0xe   :  { %195 = vmatprep.mubr.f32.mxu0 %v1399_v0  ;;  %1281 = vmatprep.subr.mxu1 %v1399_v0  ;;  %v62_v2 = vld [vmem:[%s1892_s1 + $0x10] sm:$0xf]  ;;  %v61_v3 = vld [vmem:[%s1892_s1 + $0x8] sm:$0xff]  ;;  %v60_v4 = vld [vmem:[%s1892_s1] sm:$0xff]  ;;  %vm75_vm1 = vcmask 97280   ;;  %vm352_vm2 = vcmask 523264  }
   0xf   :  { %1171 = vmatprep.subr.msk.mxu0 %vm124_vm0, %v63_v1  ;;  %v42_v5 = vld [vmem:[%s1891_s0] sm:$0xff]  ;;  %v43_v6 = vld [vmem:[%s1891_s0 + $0x8] sm:$0xff]  ;;  %v339_v7 = vld [vmem:[%s1893_s2 + $0x78] sm:$0xff]  ;;  %v66_v46 = vshrl.u32 %v65_v45, 7  ;;  %vm827_vm3 = vcmask 392192   ;;  %vm965_vm4 = vcmask 261120  }
  0x10   :  { %1172 = vmatpush1.msk.msra.mxu0 %vm124_vm0, %v62_v2  ;;  %v338_v8 = vld [vmem:[%s1893_s2 + $0x70] sm:$0xff]  ;;  %1305 = vmatpush1.msra.mxu1 %v339_v7  ;;  %v337_v9 = vld [vmem:[%s1893_s2 + $0x68] sm:$0xff]  ;;  %v336_v11 = vld [vmem:[%s1893_s2 + $0x60] sm:$0xff]  ;;  %vm1401_vm9 = vmmov 0  }
  0x11   :  { %161 = vmatprep.subr.mxu0 %v61_v3  ;;  %1282 = vmatprep.subr.mxu1 %v1399_v0  ;;  %v44_v10 = vld [vmem:[%s1891_s0 + $0x10] sm:$0xff]  ;;  %v335_v12 = vld [vmem:[%s1893_s2 + $0x58] sm:$0xff]  ;;  %v333_v15 = vld [vmem:[%s1893_s2 + $0x48] sm:$0xff]  ;;  %v67_v47 = vsub.s32 0, %v66_v46  ;;  %v71_v49 = vsub.s32 1, %v66_v46 }
  0x12   :  { %162 = vmatpush1.msra.mxu0 %v60_v4  ;;  %1306 = vmatpush1.msra.mxu1 %v338_v8  ;;  %v45_v13 = vld [vmem:[%s1891_s0 + $0x18] sm:$0xff]  ;;  %v334_v14 = vld [vmem:[%s1893_s2 + $0x50] sm:$0xff]  ;;  %v46_v16 = vld [vmem:[%s1891_s0 + $0x20] sm:$0xff] }
  0x13   :  { %1173 = vmatmul.mubr.msk.f32.vlgmr.msra.gmra.mxu0 %vm75_vm1, %v42_v5  ;;  %401 = vmatprep.subr.mxu0 %v1399_v0  ;;  %v332_v17 = vld [vmem:[%s1893_s2 + $0x40] sm:$0xff]  ;;  %v331_v18 = vld [vmem:[%s1893_s2 + $0x38] sm:$0xff]  ;;  %v47_v19 = vld [vmem:[%s1891_s0 + $0x28] sm:$0xff] }
  0x14   :  { %201 = vmatprep.mubr.f32.mxu0 %v1399_v0  ;;  %402 = vmatpush1.msra.mxu0 %v339_v7  ;;  %v330_v20 = vld [vmem:[%s1893_s2 + $0x30] sm:$0xff]  ;;  %v329_v21 = vld [vmem:[%s1893_s2 + $0x28] sm:$0xff]  ;;  %v328_v23 = vld [vmem:[%s1893_s2 + $0x20] sm:$0xff] }
  0x15   :  { %403 = vmatprep.subr.mxu0 %v1399_v0  ;;  %1283 = vmatprep.subr.mxu1 %v1399_v0  ;;  %v48_v22 = vld [vmem:[%s1891_s0 + $0x30] sm:$0xff]  ;;  %v327_v24 = vld [vmem:[%s1893_s2 + $0x18] sm:$0xff]  ;;  %v325_v27 = vld [vmem:[%s1893_s2 + $0x8] sm:$0xff] }
  0x16   :  { %404 = vmatpush1.msra.mxu0 %v338_v8  ;;  %1307 = vmatpush1.msra.mxu1 %v337_v9  ;;  %v49_v25 = vld [vmem:[%s1891_s0 + $0x38] sm:$0xff]  ;;  %v326_v26 = vld [vmem:[%s1893_s2 + $0x10] sm:$0xff]  ;;  %v50_v28 = vld [vmem:[%s1891_s0 + $0x40] sm:$0xff] }
  0x17   :  { %1174 = vmatmul.mubr.msk.f32.gmra.mxu0 %vm75_vm1, %v43_v6  ;;  %405 = vmatprep.subr.mxu0 %v1399_v0  ;;  %v324_v29 = vld [vmem:[%s1893_s2] sm:$0xff]  ;;  %v347_v30 = vld [vmem:[%s1893_s2 + $0xb8] sm:$0xff]  ;;  %v51_v31 = vld [vmem:[%s1891_s0 + $0x48] sm:$0xff] }
  0x18   :  { %207 = vmatprep.mubr.f32.mxu0 %v1399_v0  ;;  %406 = vmatpush1.msra.mxu0 %v337_v9  ;;  %v346_v32 = vld [vmem:[%s1893_s2 + $0xb0] sm:$0xff]  ;;  %v345_v33 = vld [vmem:[%s1893_s2 + $0xa8] sm:$0xff]  ;;  %v344_v35 = vld [vmem:[%s1893_s2 + $0xa0] sm:$0xff] }
  0x19   :  { %407 = vmatprep.subr.mxu0 %v1399_v0  ;;  %1284 = vmatprep.subr.mxu1 %v1399_v0  ;;  %v52_v34 = vld [vmem:[%s1891_s0 + $0x50] sm:$0xff]  ;;  %v53_v36 = vld [vmem:[%s1891_s0 + $0x58] sm:$0xff]  ;;  %v54_v38 = vld [vmem:[%s1891_s0 + $0x60] sm:$0xff] }
  0x1a   :  { %408 = vmatpush1.msra.mxu0 %v336_v11  ;;  %1308 = vmatpush1.msra.mxu1 %v336_v11  ;;  %v343_v37 = vld [vmem:[%s1893_s2 + $0x98] sm:$0xff]  ;;  %v55_v39 = vld [vmem:[%s1891_s0 + $0x68] sm:$0xff]  ;;  %v56_v40 = vld [vmem:[%s1891_s0 + $0x70] sm:$0xff] }
  0x1b   :  { %1175 = vmatmul.mubr.msk.f32.gmra.mxu0 %vm75_vm1, %v44_v10  ;;  %409 = vmatprep.subr.mxu0 %v1399_v0  ;;  %v57_v41 = vld [vmem:[%s1891_s0 + $0x78] sm:$0xff]  ;;  %v342_v42 = vld [vmem:[%s1893_s2 + $0x90] sm:$0xff]  ;;  %v341_v43 = vld [vmem:[%s1893_s2 + $0x88] sm:$0xff] }
  0x1c   :  { %213 = vmatprep.mubr.f32.mxu0 %v1399_v0  ;;  %410 = vmatpush1.msra.mxu0 %v335_v12  ;;  %v340_v44 = vld [vmem:[%s1893_s2 + $0x80] sm:$0xff] }
  0x1d   :  { %411 = vmatprep.subr.mxu0 %v1399_v0  ;;  %1285 = vmatprep.subr.mxu1 %v1399_v0  ;;  %v58_v48 = vld [vmem:[%s1897_s6] ss:$2 sm:$0x3] }
  0x1e   :  { %412 = vmatpush1.msra.mxu0 %v334_v14  ;;  %1309 = vmatpush1.msra.mxu1 %v335_v12  ;;  %v1666_v50 = vrot.slane %v58_v48, %v67_v47  ;;  %v1668_v51 = vrot.slane %v58_v48, %v71_v49 }
  0x1f   :  { %1176 = vmatmul.mubr.msk.f32.gmra.mxu0 %vm75_vm1, %v45_v13  ;;  %413 = vmatprep.subr.mxu0 %v1399_v0 }
  0x20   :  { %219 = vmatprep.mubr.f32.mxu0 %v1399_v0  ;;  %414 = vmatpush1.msra.mxu0 %v333_v15 }
  0x21   :  { %415 = vmatprep.subr.mxu0 %v1399_v0  ;;  %1286 = vmatprep.subr.mxu1 %v1399_v0 }
  0x22   :  { %416 = vmatpush1.msra.mxu0 %v332_v17  ;;  %1310 = vmatpush1.msra.mxu1 %v334_v14 }
  0x23   :  { %1177 = vmatmul.mubr.msk.f32.gmra.mxu0 %vm75_vm1, %v46_v16  ;;  %417 = vmatprep.subr.mxu0 %v1399_v0 }
  0x24   :  { %225 = vmatprep.mubr.f32.mxu0 %v1399_v0  ;;  %418 = vmatpush1.msra.mxu0 %v331_v18 }
  0x25   :  { %419 = vmatprep.subr.mxu0 %v1399_v0  ;;  %1287 = vmatprep.subr.mxu1 %v1399_v0 }
  0x26   :  { %420 = vmatpush1.msra.mxu0 %v330_v20  ;;  %1311 = vmatpush1.msra.mxu1 %v333_v15 }
  0x27   :  { %1178 = vmatmul.mubr.msk.f32.gmra.mxu0 %vm75_vm1, %v47_v19  ;;  %421 = vmatprep.subr.mxu0 %v1399_v0 }
  0x28   :  { %231 = vmatprep.mubr.f32.mxu0 %v1399_v0  ;;  %422 = vmatpush1.msra.mxu0 %v329_v21 }
  0x29   :  { %423 = vmatprep.subr.mxu0 %v1399_v0  ;;  %1288 = vmatprep.subr.mxu1 %v1399_v0 }
  0x2a   :  { %424 = vmatpush1.msra.mxu0 %v328_v23  ;;  %1312 = vmatpush1.msra.mxu1 %v332_v17 }
  0x2b   :  { %1179 = vmatmul.mubr.msk.f32.gmra.mxu0 %vm75_vm1, %v48_v22  ;;  %425 = vmatprep.subr.mxu0 %v1399_v0 }
  0x2c   :  { %237 = vmatprep.mubr.f32.mxu0 %v1399_v0  ;;  %426 = vmatpush1.msra.mxu0 %v327_v24 }
  0x2d   :  { %427 = vmatprep.subr.mxu0 %v1399_v0  ;;  %1289 = vmatprep.subr.mxu1 %v1399_v0 }
  0x2e   :  { %428 = vmatpush1.msra.mxu0 %v326_v26  ;;  %1313 = vmatpush1.msra.mxu1 %v331_v18 }
  0x2f   :  { %1180 = vmatmul.mubr.msk.f32.gmra.mxu0 %vm75_vm1, %v49_v25  ;;  %429 = vmatprep.subr.mxu0 %v1399_v0 }
  0x30   :  { %243 = vmatprep.mubr.f32.mxu0 %v1399_v0  ;;  %430 = vmatpush1.msra.mxu0 %v325_v27 }
  0x31   :  { %431 = vmatprep.subr.mxu0 %v1399_v0  ;;  %1290 = vmatprep.subr.mxu1 %v1399_v0 }
  0x32   :  { %432 = vmatpush1.msra.mxu0 %v324_v29  ;;  %1314 = vmatpush1.msra.mxu1 %v330_v20 }
  0x33   :  { %1181 = vmatmul.mubr.msk.f32.gmra.mxu0 %vm75_vm1, %v50_v28  ;;  %449 = vmatprep.subr.mxu0 %v1399_v0 }
  0x34   :  { %249 = vmatprep.mubr.f32.mxu0 %v1399_v0  ;;  %450 = vmatpush2.msra.mxu0 %v347_v30 }
  0x35   :  { %451 = vmatprep.subr.mxu0 %v1399_v0  ;;  %1291 = vmatprep.subr.mxu1 %v1399_v0 }
  0x36   :  { %452 = vmatpush2.msra.mxu0 %v346_v32  ;;  %1315 = vmatpush1.msra.mxu1 %v329_v21 }
  0x37   :  { %1182 = vmatmul.mubr.msk.f32.gmra.mxu0 %vm75_vm1, %v51_v31  ;;  %453 = vmatprep.subr.mxu0 %v1399_v0 }
  0x38   :  { %255 = vmatprep.mubr.f32.mxu0 %v1399_v0  ;;  %454 = vmatpush2.msra.mxu0 %v345_v33 }
  0x39   :  { %1292 = vmatprep.subr.mxu1 %v1399_v0  ;;  %455 = vmatprep.subr.mxu0 %v1399_v0 }
  0x3a   :  { %1316 = vmatpush1.msra.mxu1 %v328_v23  ;;  %456 = vmatpush2.msra.mxu0 %v344_v35 }
  0x3b   :  { %1183 = vmatmul.mubr.msk.f32.gmra.mxu0 %vm75_vm1, %v52_v34  ;;  %1293 = vmatprep.subr.mxu1 %v1399_v0 }
  0x3c   :  { %261 = vmatprep.mubr.f32.mxu0 %v1399_v0  ;;  %1317 = vmatpush1.msra.mxu1 %v327_v24 }
  0x3d   :  { %1294 = vmatprep.subr.mxu1 %v1399_v0  ;;  %457 = vmatprep.subr.mxu0 %v1399_v0 }
  0x3e   :  { %1318 = vmatpush1.msra.mxu1 %v326_v26  ;;  %458 = vmatpush2.msra.mxu0 %v343_v37 }
  0x3f   :  { %1184 = vmatmul.mubr.msk.f32.gmra.mxu0 %vm75_vm1, %v53_v36  ;;  %1295 = vmatprep.subr.mxu1 %v1399_v0 }
  0x40   :  { %267 = vmatprep.mubr.f32.mxu0 %v1399_v0  ;;  %459 = vmatprep.subr.mxu0 %v1399_v0 }
  0x41   :  { %1319 = vmatpush1.msra.mxu1 %v325_v27  ;;  %460 = vmatpush2.msra.mxu0 %v342_v42 }
  0x42   :  { %1296 = vmatprep.subr.mxu1 %v1399_v0  ;;  %461 = vmatprep.subr.mxu0 %v1399_v0 }
  0x43   :  { %1185 = vmatmul.mubr.msk.f32.gmra.mxu0 %vm75_vm1, %v54_v38  ;;  %1320 = vmatpush1.msra.mxu1 %v324_v29 }
  0x44   :  { %273 = vmatprep.mubr.f32.mxu0 %v1399_v0  ;;  %1297 = vmatprep.subr.mxu1 %v1399_v0 }
  0x45   :  { %1321 = vmatpush2.msra.mxu1 %v347_v30  ;;  %462 = vmatpush2.msra.mxu0 %v341_v43 }
  0x46   :  { %1298 = vmatprep.subr.mxu1 %v1399_v0  ;;  %463 = vmatprep.subr.mxu0 %v1399_v0 }
  0x47   :  { %1186 = vmatmul.mubr.msk.f32.gmra.mxu0 %vm75_vm1, %v55_v39  ;;  %1322 = vmatpush2.msra.mxu1 %v346_v32 }
  0x48   :  { %279 = vmatprep.mubr.f32.mxu0 %v1399_v0  ;;  %1299 = vmatprep.subr.mxu1 %v1399_v0 }
  0x49   :  { %1323 = vmatpush2.msra.mxu1 %v345_v33  ;;  %464 = vmatpush2.msra.mxu0 %v340_v44 }
  0x4a   :  { %1300 = vmatprep.subr.mxu1 %v1399_v0 }
  0x4b   :  { %1187 = vmatmul.mubr.msk.f32.gmra.mxu0 %vm75_vm1, %v56_v40  ;;  %1324 = vmatpush2.msra.mxu1 %v344_v35 }
  0x4c   :  { %285 = vmatprep.mubr.f32.mxu0 %v1399_v0  ;;  %1301 = vmatprep.subr.mxu1 %v1399_v0 }
  0x4d   :  { %1325 = vmatpush2.msra.mxu1 %v343_v37 }
  0x4e   :  { %1302 = vmatprep.subr.mxu1 %v1399_v0 }
  0x4f   :  { %1188 = vmatmul.mubr.msk.f32.gmra.mxu0 %vm75_vm1, %v57_v41  ;;  %1326 = vmatpush2.msra.mxu1 %v342_v42 }
  0x50   :  { %1303 = vmatprep.subr.mxu1 %v1399_v0 }
  0x51   :  { %1327 = vmatpush2.msra.mxu1 %v341_v43 }
  0x52   :  { %1304 = vmatprep.subr.mxu1 %v1399_v0 }
  0x53   :  { %1328 = vmatpush2.msra.mxu1 %v340_v44 }
  0xd3   :  { %v197_v52 = vpop.f32.mrf.mxu0 }
  0xd4   :  { %v198_v53 = vadd.f32 %v197_v52, %v1666_v50 }
  0xd5   :  { %v199_v54 = vpop.f32.mrf.mxu0 }
  0xd6   :  { %v200_v55 = vadd.f32 %v199_v54, %v1668_v51  ;;  %v292_v58 = vmax.f32 %v198_v53, 0.0 }
  0xd7   :  { %v203_v56 = vpop.f32.mrf.mxu0 }
  0xd8   :  { %v293_v57 = vmax.f32 %v200_v55, 0.0  ;;  %v204_v59 = vadd.f32 %v203_v56, %v1666_v50 }
  0xd9   :  { %v205_v60 = vpop.f32.mrf.mxu0 }
  0xda   :  { %v206_v61 = vadd.f32 %v205_v60, %v1668_v51  ;;  %1190 = vmatprep.mubr.msk.f32.mxu0 %vm352_vm2, %v293_v57  ;;  %v294_v1 = vmax.f32 %v204_v59, 0.0 }
  0xdb   :  { %v209_v62 = vpop.f32.mrf.mxu0  ;;  %466 = vmatmul.mubr.f32.vlgmr.msra.gmra.mxu0 %v292_v58 }
  0xdc   :  { %v295_v63 = vmax.f32 %v206_v61, 0.0  ;;  %v210_v2 = vadd.f32 %v209_v62, %v1666_v50 }
  0xdd   :  { %v211_v3 = vpop.f32.mrf.mxu0 }
  0xde   :  { %v212_v4 = vadd.f32 %v211_v3, %v1668_v51  ;;  %1191 = vmatprep.mubr.msk.f32.mxu0 %vm352_vm2, %v295_v63  ;;  %v296_v7 = vmax.f32 %v210_v2, 0.0 }
  0xdf   :  { %v215_v5 = vpop.f32.mrf.mxu0  ;;  %471 = vmatmul.mubr.f32.gmra.mxu0 %v294_v1 }
  0xe0   :  { %v297_v6 = vmax.f32 %v212_v4, 0.0  ;;  %v216_v8 = vadd.f32 %v215_v5, %v1666_v50 }
  0xe1   :  { %v217_v9 = vpop.f32.mrf.mxu0 }
  0xe2   :  { %v218_v10 = vadd.f32 %v217_v9, %v1668_v51  ;;  %1192 = vmatprep.mubr.msk.f32.mxu0 %vm352_vm2, %v297_v6  ;;  %v298_v13 = vmax.f32 %v216_v8, 0.0 }
  0xe3   :  { %v221_v11 = vpop.f32.mrf.mxu0  ;;  %476 = vmatmul.mubr.f32.gmra.mxu0 %v296_v7 }
  0xe4   :  { %v299_v12 = vmax.f32 %v218_v10, 0.0  ;;  %v222_v14 = vadd.f32 %v221_v11, %v1666_v50 }
  0xe5   :  { %v223_v15 = vpop.f32.mrf.mxu0 }
  0xe6   :  { %v224_v16 = vadd.f32 %v223_v15, %v1668_v51  ;;  %1193 = vmatprep.mubr.msk.f32.mxu1 %vm352_vm2, %v299_v12  ;;  %v300_v19 = vmax.f32 %v222_v14, 0.0 }
  0xe7   :  { %v227_v17 = vpop.f32.mrf.mxu0  ;;  %481 = vmatmul.mubr.f32.vlgmr.msra.gmra.mxu1 %v298_v13 }
  0xe8   :  { %v301_v18 = vmax.f32 %v224_v16, 0.0  ;;  %v228_v20 = vadd.f32 %v227_v17, %v1666_v50 }
  0xe9   :  { %v229_v21 = vpop.f32.mrf.mxu0 }
  0xea   :  { %v230_v22 = vadd.f32 %v229_v21, %v1668_v51  ;;  %1194 = vmatprep.mubr.msk.f32.mxu1 %vm352_vm2, %v301_v18  ;;  %v302_v25 = vmax.f32 %v228_v20, 0.0 }
  0xeb   :  { %v233_v23 = vpop.f32.mrf.mxu0  ;;  %486 = vmatmul.mubr.f32.gmra.mxu1 %v300_v19 }
  0xec   :  { %v303_v24 = vmax.f32 %v230_v22, 0.0  ;;  %v234_v26 = vadd.f32 %v233_v23, %v1666_v50 }
  0xed   :  { %v235_v27 = vpop.f32.mrf.mxu0 }
  0xee   :  { %v236_v28 = vadd.f32 %v235_v27, %v1668_v51  ;;  %1195 = vmatprep.mubr.msk.f32.mxu1 %vm352_vm2, %v303_v24  ;;  %v304_v31 = vmax.f32 %v234_v26, 0.0  ;;  %v708_v24 = vld [vmem:[%s1898_s7 + $0x70] sm:$0xff]  ;;  %v709_v27 = vld [vmem:[%s1898_s7 + $0x78] sm:$0xff] }
  0xef   :  { %v239_v29 = vpop.f32.mrf.mxu0  ;;  %491 = vmatmul.mubr.f32.gmra.mxu1 %v302_v25  ;;  %v1400_v25 = vmov 0   ;;  %v595_v26 = vld [vmem:[%s1898_s7 + $0x50] sm:$0xff] }
  0xf0   :  { %v305_v30 = vmax.f32 %v236_v28, 0.0  ;;  %v240_v32 = vadd.f32 %v239_v29, %v1666_v50  ;;  %1334 = vset.pattern.permute.xlu1 %v1400_v25  ;;  %v594_v28 = vld [vmem:[%s1898_s7 + $0x48] sm:$0xff]  ;;  %v597_v29 = vld [vmem:[%s1898_s7 + $0x60] sm:$0xff] }
  0xf1   :  { %v241_v33 = vpop.f32.mrf.mxu0  ;;  %780 = vperm.xlu1 %1334, %v708_v24  }
  0xf2   :  { %v242_v34 = vadd.f32 %v241_v33, %v1668_v51  ;;  %1196 = vmatprep.mubr.msk.f32.mxu1 %vm352_vm2, %v305_v30  ;;  %v306_v37 = vmax.f32 %v240_v32, 0.0  ;;  %v596_v30 = vld [vmem:[%s1898_s7 + $0x58] sm:$0xff]  ;;  %v805_v32 = vld [vmem:[%s1898_s7 + $0x10] sm:$0xff]  ;;  %v804_v33 = vld [vmem:[%s1898_s7 + $0x8] sm:$0xff] }
  0xf3   :  { %v245_v35 = vpop.f32.mrf.mxu0  ;;  %496 = vmatmul.mubr.f32.gmra.mxu1 %v304_v31  ;;  %v806_v31 = vld [vmem:[%s1898_s7 + $0x18] sm:$0xff] }
  0xf4   :  { %v307_v36 = vmax.f32 %v242_v34, 0.0  ;;  %v246_v38 = vadd.f32 %v245_v35, %v1666_v50  ;;  %v803_v34 = vld [vmem:[%s1898_s7] sm:$0xff] }
  0xf5   :  { %v247_v39 = vpop.f32.mrf.mxu0  ;;  %v1758_v35 = vld [vmem:[%s1897_s6 + $0x1] ss:$0 sm:$0xff] }
  0xf6   :  { %v248_v40 = vadd.f32 %v247_v39, %v1668_v51  ;;  %1197 = vmatprep.mubr.msk.f32.mxu1 %vm352_vm2, %v307_v36  ;;  %v308_v43 = vmax.f32 %v246_v38, 0.0  ;;  %v944_v38 = vld [vmem:[%s1898_s7 + $0x38] sm:$0xff] }
  0xf7   :  { %v251_v41 = vpop.f32.mrf.mxu0  ;;  %501 = vmatmul.mubr.f32.gmra.mxu1 %v306_v37 }
  0xf8   :  { %v309_v42 = vmax.f32 %v248_v40, 0.0  ;;  %v252_v44 = vadd.f32 %v251_v41, %v1666_v50 }
  0xf9   :  { %v253_v45 = vpop.f32.mrf.mxu0 }
  0xfa   :  { %v254_v46 = vadd.f32 %v253_v45, %v1668_v51  ;;  %1198 = vmatprep.mubr.msk.f32.mxu1 %vm352_vm2, %v309_v42  ;;  %v310_v49 = vmax.f32 %v252_v44, 0.0 }
  0xfb   :  { %v257_v47 = vpop.f32.mrf.mxu0  ;;  %506 = vmatmul.mubr.f32.gmra.mxu1 %v308_v43  ;;  %v943_v43 = vld [vmem:[%s1898_s7 + $0x30] sm:$0xff] }
  0xfc   :  { %v311_v48 = vmax.f32 %v254_v46, 0.0  ;;  %v258_v52 = vadd.f32 %v257_v47, %v1666_v50 }
  0xfd   :  { %v259_v53 = vpop.f32.mrf.mxu0 }
  0xfe   :  { %v260_v54 = vadd.f32 %v259_v53, %v1668_v51  ;;  %1199 = vmatprep.mubr.msk.f32.mxu1 %vm352_vm2, %v311_v48  ;;  %v312_v57 = vmax.f32 %v258_v52, 0.0 }
  0xff   :  { %v263_v55 = vpop.f32.mrf.mxu0  ;;  %511 = vmatmul.mubr.f32.gmra.mxu1 %v310_v49  ;;  %v942_v49 = vld [vmem:[%s1898_s7 + $0x28] sm:$0xff] }
 0x100   :  { %v313_v56 = vmax.f32 %v260_v54, 0.0  ;;  %v264_v58 = vadd.f32 %v263_v55, %v1666_v50 }
 0x101   :  { %v265_v59 = vpop.f32.mrf.mxu0 }
 0x102   :  { %v266_v60 = vadd.f32 %v265_v59, %v1668_v51  ;;  %1200 = vmatprep.mubr.msk.f32.mxu1 %vm352_vm2, %v313_v56  ;;  %v314_v63 = vmax.f32 %v264_v58, 0.0 }
 0x103   :  { %v269_v61 = vpop.f32.mrf.mxu0  ;;  %516 = vmatmul.mubr.f32.gmra.mxu1 %v312_v57  ;;  %v941_v57 = vld [vmem:[%s1898_s7 + $0x20] sm:$0xff] }
 0x104   :  { %v315_v62 = vmax.f32 %v266_v60, 0.0  ;;  %v270_v1 = vadd.f32 %v269_v61, %v1666_v50 }
 0x105   :  { %v271_v2 = vpop.f32.mrf.mxu0 }
 0x106   :  { %v272_v3 = vadd.f32 %v271_v2, %v1668_v51  ;;  %1201 = vmatprep.mubr.msk.f32.mxu1 %vm352_vm2, %v315_v62  ;;  %v316_v6 = vmax.f32 %v270_v1, 0.0 }
 0x107   :  { %v275_v4 = vpop.f32.mrf.mxu0  ;;  %521 = vmatmul.mubr.f32.gmra.mxu1 %v314_v63 }
 0x108   :  { %v317_v5 = vmax.f32 %v272_v3, 0.0  ;;  %v276_v7 = vadd.f32 %v275_v4, %v1666_v50 }
 0x109   :  { %v277_v8 = vpop.f32.mrf.mxu0 }
 0x10a   :  { %v278_v9 = vadd.f32 %v277_v8, %v1668_v51  ;;  %1202 = vmatprep.mubr.msk.f32.mxu1 %vm352_vm2, %v317_v5  ;;  %v318_v12 = vmax.f32 %v276_v7, 0.0 }
 0x10b   :  { %v281_v10 = vpop.f32.mrf.mxu0  ;;  %526 = vmatmul.mubr.f32.gmra.mxu1 %v316_v6 }
 0x10c   :  { %v319_v11 = vmax.f32 %v278_v9, 0.0  ;;  %v282_v13 = vadd.f32 %v281_v10, %v1666_v50 }
 0x10d   :  { %v283_v14 = vpop.f32.mrf.mxu0 }
 0x10e   :  { %v284_v15 = vadd.f32 %v283_v14, %v1668_v51  ;;  %1203 = vmatprep.mubr.msk.f32.mxu1 %vm352_vm2, %v319_v11  ;;  %v320_v18 = vmax.f32 %v282_v13, 0.0 }
 0x10f   :  { %v287_v16 = vpop.f32.mrf.mxu0  ;;  %531 = vmatmul.mubr.f32.gmra.mxu1 %v318_v12 }
 0x110   :  { %v321_v17 = vmax.f32 %v284_v15, 0.0  ;;  %v288_v19 = vadd.f32 %v287_v16, %v1666_v50  ;;  %v707_v50 = vld [vmem:[%s1898_s7 + $0x68] sm:$0xff] }
 0x111   :  { %v289_v20 = vpop.f32.mrf.mxu0  ;;  %775 = vperm.xlu1 %1334, %v707_v50  }
 0x112   :  { %v290_v21 = vadd.f32 %v289_v20, %v1668_v51  ;;  %1204 = vmatprep.mubr.msk.f32.mxu1 %vm352_vm2, %v321_v17  ;;  %v322_v23 = vmax.f32 %v288_v19, 0.0  ;;  %v710_v51 = vld [vmem:[%s1898_s7 + $0x80] sm:$0xff] }
 0x113   :  { %536 = vmatmul.mubr.f32.gmra.mxu1 %v320_v18 }
 0x114   :  { %v323_v22 = vmax.f32 %v290_v21, 0.0 }
 0x115   :  { %792 = vperm.xlu1 %1334, %v710_v51  }
 0x116   :  { %1205 = vmatprep.mubr.msk.f32.mxu1 %vm352_vm2, %v323_v22 }
 0x117   :  { %541 = vmatmul.mubr.f32.gmra.mxu1 %v322_v23 }
 0x119   :  { %688 = vperm.xlu1 %1334, %v595_v26  }
 0x11d   :  { %787 = vperm.xlu1 %1334, %v709_v27  }
 0x121   :  { %683 = vperm.xlu1 %1334, %v594_v28  }
 0x125   :  { %700 = vperm.xlu1 %1334, %v597_v29  }
 0x129   :  { %695 = vperm.xlu1 %1334, %v596_v30  }
 0x12d   :  { %824 = vperm.xlu1 %1334, %v806_v31  }
 0x131   :  { %819 = vperm.xlu1 %1334, %v805_v32  }
 0x135   :  { %814 = vperm.xlu1 %1334, %v804_v33  }
 0x139   :  { %809 = vperm.xlu1 %1334, %v803_v34  }
 0x13d   :  { %962 = vperm.xlu1 %1334, %v944_v38  }
 0x141   :  { %957 = vperm.xlu1 %1334, %v943_v43  }
 0x145   :  { %952 = vperm.xlu1 %1334, %v942_v49  }
 0x149   :  { %947 = vperm.xlu1 %1334, %v941_v57  }
 0x19b   :  { %v467_v36 = vpop.f32.mrf.mxu0 }
 0x19c   :  { %v468_v37 = vadd.f32 %v1758_v35, %v467_v36 }
 0x19d   :  { %v469_v39 = vpop.f32.mrf.mxu0 }
 0x19e   :  { %v546_v40 = vmax.f32 %v468_v37, 0.0 }
 0x19f   :  { %v472_v41 = vpop.f32.mrf.mxu0 }
 0x1a0   :  { %v473_v42 = vadd.f32 %v1758_v35, %v472_v41  ;;  %562 = vxpose.xlu0.b32.start [1/16] (narrow) %v546_v40, 96 }
 0x1a1   :  { %v474_v44 = vpop.f32.mrf.mxu0 }
 0x1a2   :  { %v547_v45 = vmax.f32 %v473_v42, 0.0 }
 0x1a3   :  { %v477_v46 = vpop.f32.mrf.mxu0 }
 0x1a4   :  { %v478_v47 = vadd.f32 %v1758_v35, %v477_v46  ;;  %563 = vxpose.xlu0.b32.cont [2/16] (narrow) %v547_v45, 96 }
 0x1a5   :  { %v479_v48 = vpop.f32.mrf.mxu0 }
 0x1a6   :  { %v548_v52 = vmax.f32 %v478_v47, 0.0 }
 0x1a7   :  { %v482_v53 = vpop.f32.mrf.mxu1 }
 0x1a8   :  { %v483_v54 = vadd.f32 %v1758_v35, %v482_v53  ;;  %564 = vxpose.xlu0.b32.cont [3/16] (narrow) %v548_v52, 96 }
 0x1a9   :  { %v484_v55 = vpop.f32.mrf.mxu1 }
 0x1aa   :  { %v549_v56 = vmax.f32 %v483_v54, 0.0 }
 0x1ab   :  { %v487_v58 = vpop.f32.mrf.mxu1 }
 0x1ac   :  { %v488_v59 = vadd.f32 %v1758_v35, %v487_v58  ;;  %565 = vxpose.xlu0.b32.cont [4/16] (narrow) %v549_v56, 96 }
 0x1ad   :  { %v489_v60 = vpop.f32.mrf.mxu1 }
 0x1ae   :  { %v550_v61 = vmax.f32 %v488_v59, 0.0 }
 0x1af   :  { %v492_v62 = vpop.f32.mrf.mxu1 }
 0x1b0   :  { %v493_v63 = vadd.f32 %v1758_v35, %v492_v62  ;;  %566 = vxpose.xlu0.b32.cont [5/16] (narrow) %v550_v61, 96 }
 0x1b1   :  { %v494_v1 = vpop.f32.mrf.mxu1 }
 0x1b2   :  { %v551_v2 = vmax.f32 %v493_v63, 0.0 }
 0x1b3   :  { %v497_v3 = vpop.f32.mrf.mxu1 }
 0x1b4   :  { %v498_v4 = vadd.f32 %v1758_v35, %v497_v3  ;;  %567 = vxpose.xlu0.b32.cont [6/16] (narrow) %v551_v2, 96 }
 0x1b5   :  { %v499_v5 = vpop.f32.mrf.mxu1 }
 0x1b6   :  { %v552_v6 = vmax.f32 %v498_v4, 0.0 }
 0x1b7   :  { %v502_v7 = vpop.f32.mrf.mxu1 }
 0x1b8   :  { %v503_v8 = vadd.f32 %v1758_v35, %v502_v7  ;;  %568 = vxpose.xlu0.b32.cont [7/16] (narrow) %v552_v6, 96 }
 0x1b9   :  { %v504_v9 = vpop.f32.mrf.mxu1 }
 0x1ba   :  { %v553_v10 = vmax.f32 %v503_v8, 0.0 }
 0x1bb   :  { %v507_v11 = vpop.f32.mrf.mxu1 }
 0x1bc   :  { %v508_v12 = vadd.f32 %v1758_v35, %v507_v11  ;;  %569 = vxpose.xlu0.b32.cont [8/16] (narrow) %v553_v10, 96 }
 0x1bd   :  { %v509_v13 = vpop.f32.mrf.mxu1 }
 0x1be   :  { %v554_v14 = vmax.f32 %v508_v12, 0.0 }
 0x1bf   :  { %v512_v15 = vpop.f32.mrf.mxu1 }
 0x1c0   :  { %v513_v16 = vadd.f32 %v1758_v35, %v512_v15  ;;  %570 = vxpose.xlu0.b32.cont [9/16] (narrow) %v554_v14, 96 }
 0x1c1   :  { %v514_v17 = vpop.f32.mrf.mxu1 }
 0x1c2   :  { %v555_v18 = vmax.f32 %v513_v16, 0.0 }
 0x1c3   :  { %v517_v19 = vpop.f32.mrf.mxu1 }
 0x1c4   :  { %v518_v20 = vadd.f32 %v1758_v35, %v517_v19  ;;  %571 = vxpose.xlu0.b32.cont [10/16] (narrow) %v555_v18, 96 }
 0x1c5   :  { %v519_v21 = vpop.f32.mrf.mxu1 }
 0x1c6   :  { %v556_v22 = vmax.f32 %v518_v20, 0.0 }
 0x1c7   :  { %v522_v23 = vpop.f32.mrf.mxu1 }
 0x1c8   :  { %v523_v24 = vadd.f32 %v1758_v35, %v522_v23  ;;  %572 = vxpose.xlu0.b32.cont [11/16] (narrow) %v556_v22, 96 }
 0x1c9   :  { %v524_v50 = vpop.f32.mrf.mxu1 }
 0x1ca   :  { %v557_v51 = vmax.f32 %v523_v24, 0.0 }
 0x1cb   :  { %v527_v26 = vpop.f32.mrf.mxu1 }
 0x1cc   :  { %v528_v27 = vadd.f32 %v1758_v35, %v527_v26  ;;  %573 = vxpose.xlu0.b32.cont [12/16] (narrow) %v557_v51, 96 }
 0x1cd   :  { %v529_v28 = vpop.f32.mrf.mxu1 }
 0x1ce   :  { %v558_v29 = vmax.f32 %v528_v27, 0.0 }
 0x1cf   :  { %v532_v30 = vpop.f32.mrf.mxu1 }
 0x1d0   :  { %v533_v31 = vadd.f32 %v1758_v35, %v532_v30  ;;  %574 = vxpose.xlu0.b32.cont [13/16] (narrow) %v558_v29, 96 }
 0x1d1   :  { %v534_v32 = vpop.f32.mrf.mxu1 }
 0x1d2   :  { %v559_v33 = vmax.f32 %v533_v31, 0.0 }
 0x1d3   :  { %v537_v34 = vpop.f32.mrf.mxu1 }
 0x1d4   :  { %v538_v36 = vadd.f32 %v1758_v35, %v537_v34  ;;  %575 = vxpose.xlu0.b32.cont [14/16] (narrow) %v559_v33, 96 }
 0x1d5   :  { %v539_v37 = vpop.f32.mrf.mxu1 }
 0x1d6   :  { %v560_v38 = vmax.f32 %v538_v36, 0.0  ;;  %v799_v36 = vld [vmem:[%s1894_s3] sm:$0xff] }
 0x1d7   :  { %v542_v39 = vpop.f32.mrf.mxu1  ;;  %1250 = vmatprep.mubr.msk.f32.mxu0 %vm827_vm3, %v799_v36 }
 0x1d8   :  { %v543_v40 = vadd.f32 %v1758_v35, %v542_v39  ;;  %576 = vxpose.xlu0.b32.cont [15/16] (narrow) %v560_v38, 96 }
 0x1d9   :  { %v544_v41 = vpop.f32.mrf.mxu1 }
 0x1da   :  { %v561_v42 = vmax.f32 %v543_v40, 0.0 }
 0x1dc   :  { %577 = vxpose.xlu0.b32.end [16/16] (narrow) %v561_v42, 96 }
 0x205   :  { %1335 = vset.pattern.permute.xlu0 %v1400_v25 }
 0x21c   :  { %v1789_v43 = vpop.trf.xlu0 }
 0x220   :  { %v1791_v44 = vpop.trf.xlu0 }
 0x224   :  { %v1793_v45 = vpop.trf.xlu0 }
 0x225   :  { %v598_v47 = vmul.f32 %v1793_v45, %v1789_v43 }
 0x228   :  { %v1795_v46 = vpop.trf.xlu0 }
 0x229   :  { %v599_v35 = vmul.f32 %v1795_v46, %v1791_v44 }
 0x22b   :  { %v600_v48 = vadd.f32 %v599_v35, %v598_v47 }
 0x22c   :  { %v1801_v49 = vpop.trf.xlu0 }
 0x22d   :  { %v601_v52 = vrot.slane %v600_v48, 4  ;;  %v608_v25 = vmul.f32 %v1801_v49, %v1789_v43 }
 0x22f   :  { %v602_v55 = vadd.f32 %v601_v52, %v600_v48 }
 0x230   :  { %v1803_v53 = vpop.trf.xlu0 }
 0x231   :  { %v609_v54 = vmul.f32 %v1803_v53, %v1791_v44  ;;  %v603_v59 = vrot.slane %v602_v55, 2 }
 0x233   :  { %v610_v56 = vadd.f32 %v609_v54, %v608_v25  ;;  %v604_v2 = vadd.f32 %v603_v59, %v602_v55 }
 0x234   :  { %v1809_v57 = vpop.trf.xlu0 }
 0x235   :  { %v611_v58 = vrot.slane %v610_v56, 4  ;;  %v618_v63 = vmul.f32 %v1809_v57, %v1789_v43  ;;  %v605_v8 = vrot.slane %v604_v2, 1 }
 0x237   :  { %v612_v60 = vadd.f32 %v611_v58, %v610_v56  ;;  %v606_v15 = vadd.f32 %v605_v8, %v604_v2 }
 0x238   :  { %v1811_v61 = vpop.trf.xlu0 }
 0x239   :  { %v613_v62 = vrot.slane %v612_v60, 2  ;;  %v619_v1 = vmul.f32 %v1811_v61, %v1791_v44  ;;  %v607_v22 = vmul.f32 0.25, %v606_v15 }
 0x23b   :  { %v614_v3 = vadd.f32 %v613_v62, %v612_v60  ;;  %v620_v4 = vadd.f32 %v619_v1, %v618_v63 }
 0x23c   :  { %v1817_v5 = vpop.trf.xlu0 }
 0x23d   :  { %v615_v6 = vrot.slane %v614_v3, 1  ;;  %v621_v7 = vrot.slane %v620_v4, 4  ;;  %v711_v13 = vmul.f32 %v1817_v5, %v1789_v43 }
 0x23f   :  { %v622_v9 = vadd.f32 %v621_v7, %v620_v4  ;;  %v616_v11 = vadd.f32 %v615_v6, %v614_v3 }
 0x240   :  { %v1819_v10 = vpop.trf.xlu0 }
 0x241   :  { %v623_v12 = vrot.slane %v622_v9, 2  ;;  %v712_v14 = vmul.f32 %v1819_v10, %v1791_v44  ;;  %v617_v19 = vmul.f32 0.25, %v616_v11 }
 0x243   :  { %v624_v16 = vadd.f32 %v623_v12, %v622_v9  ;;  %v713_v17 = vadd.f32 %v712_v14, %v711_v13  ;;  %v628_v51 = vmax.f32 %v607_v22, %v617_v19 }
 0x244   :  { %v1825_v18 = vpop.trf.xlu0 }
 0x245   :  { %v625_v20 = vrot.slane %v624_v16, 1  ;;  %v714_v21 = vrot.slane %v713_v17, 4  ;;  %v721_v27 = vmul.f32 %v1825_v18, %v1789_v43 }
 0x247   :  { %v626_v23 = vadd.f32 %v625_v20, %v624_v16  ;;  %v715_v24 = vadd.f32 %v714_v21, %v713_v17 }
 0x248   :  { %v1827_v50 = vpop.trf.xlu0 }
 0x249   :  { %v627_v26 = vmul.f32 0.25, %v626_v23  ;;  %v722_v28 = vmul.f32 %v1827_v50, %v1791_v44  ;;  %v716_v29 = vrot.slane %v715_v24, 2 }
 0x24b   :  { %v629_v30 = vmax.f32 %v628_v51, %v627_v26  ;;  %v723_v31 = vadd.f32 %v722_v28, %v721_v27  ;;  %v717_v37 = vadd.f32 %v716_v29, %v715_v24 }
 0x24d   :  { %v630_v32 = vsub.f32 %v607_v22, %v629_v30  ;;  %v633_v33 = vsub.f32 %v617_v19, %v629_v30  ;;  %v636_v34 = vsub.f32 %v627_v26, %v629_v30  ;;  %v724_v38 = vrot.slane %v723_v31, 4 }
 0x24e   :  { %v718_v47 = vrot.slane %v717_v37, 1 }
 0x24f   :  { %v631_v39 = vmul.f32 1.442695, %v630_v32  ;;  %v634_v40 = vmul.f32 1.442695, %v633_v33  ;;  %v637_v41 = vmul.f32 1.442695, %v636_v34  ;;  %v725_v42 = vadd.f32 %v724_v38, %v723_v31 }
 0x250   :  { %v719_v52 = vadd.f32 %v718_v47, %v717_v37 }
 0x251   :  { %1336 = vpow2.f32 %v631_v39  ;;  %v726_v35 = vrot.slane %v725_v42, 2 }
 0x252   :  { %1338 = vpow2.f32 %v634_v40  ;;  %v720_v55 = vmul.f32 0.25, %v719_v52 }
 0x253   :  { %1340 = vpow2.f32 %v637_v41  ;;  %v727_v48 = vadd.f32 %v726_v35, %v725_v42 }
 0x255   :  { %v728_v25 = vrot.slane %v727_v48, 1 }
 0x257   :  { %v729_v54 = vadd.f32 %v728_v25, %v727_v48 }
 0x259   :  { %v730_v56 = vmul.f32 0.25, %v729_v54 }
 0x25b   :  { %v731_v58 = vmax.f32 %v720_v55, %v730_v56 }
 0x25d   :  { %v732_v60 = vsub.f32 %v720_v55, %v731_v58  ;;  %v735_v62 = vsub.f32 %v730_v56, %v731_v58 }
 0x25e   :  { %v1337_v59 = vpop.eup %1336 }
 0x25f   :  { %v1339_v63 = vpop.eup %1338  ;;  %v733_v2 = vmul.f32 1.442695, %v732_v60  ;;  %v736_v3 = vmul.f32 1.442695, %v735_v62  ;;  %v781_v60 = vpop.permute.xlu1 %780 }
 0x260   :  { %v639_v1 = vadd.f32 %v1339_v63, %v1337_v59  ;;  %v1341_v4 = vpop.eup %1340 }
 0x261   :  { %1342 = vpow2.f32 %v733_v2 }
 0x262   :  { %v640_v6 = vadd.f32 %v1341_v4, %v639_v1  ;;  %1344 = vpow2.f32 %v736_v3 }
 0x264   :  { %1346 = vrcp.f32 %v640_v6 }
 0x26e   :  { %v1343_v7 = vpop.eup %1342 }
 0x26f   :  { %v1345_v8 = vpop.eup %1344 }
 0x270   :  { %v738_v11 = vadd.f32 %v1345_v8, %v1343_v7 }
 0x271   :  { %v1347_v9 = vpop.eup %1346 }
 0x272   :  { %v643_v12 = vmul.f32 %v1347_v9, %v1337_v59  ;;  %v646_v13 = vmul.f32 %v1347_v9, %v1339_v63  ;;  %v651_v14 = vmul.f32 %v1347_v9, %v1341_v4  ;;  %1348 = vrcp.f32 %v738_v11 }
 0x274   :  { %v644_v15 = vmul.f32 %v643_v12, %v1793_v45  ;;  %v645_v16 = vmul.f32 %v643_v12, %v1795_v46  ;;  %v647_v17 = vmul.f32 %v646_v13, %v1801_v49  ;;  %v648_v19 = vmul.f32 %v646_v13, %v1803_v53 }
 0x275   :  { %v652_v22 = vmul.f32 %v651_v14, %v1809_v57  ;;  %v653_v23 = vmul.f32 %v651_v14, %v1811_v61 }
 0x276   :  { %v649_v20 = vadd.f32 %v647_v17, %v644_v15  ;;  %v650_v21 = vadd.f32 %v648_v19, %v645_v16 }
 0x278   :  { %v654_v24 = vadd.f32 %v652_v22, %v649_v20  ;;  %v655_v51 = vadd.f32 %v653_v23, %v650_v21 }
 0x27a   :  { %v656_v26 = vadd.f32 %v655_v51, %v654_v24 }
 0x27c   :  { %v657_v27 = vrot.slane %v656_v26, 4 }
 0x27e   :  { %v658_v28 = vadd.f32 %v657_v27, %v656_v26 }
 0x27f   :  { %v1349_v29 = vpop.eup %1348 }
 0x280   :  { %v659_v30 = vrot.slane %v658_v28, 2  ;;  %v741_v45 = vmul.f32 %v1349_v29, %v1343_v7  ;;  %v744_v31 = vmul.f32 %v1349_v29, %v1345_v8  ;;  %v776_v7 = vpop.permute.xlu1 %775 }
 0x282   :  { %v660_v46 = vadd.f32 %v659_v30, %v658_v28  ;;  %v742_v49 = vmul.f32 %v741_v45, %v1817_v5  ;;  %v743_v53 = vmul.f32 %v741_v45, %v1819_v10  ;;  %v745_v32 = vmul.f32 %v744_v31, %v1825_v18 }
 0x283   :  { %v746_v57 = vmul.f32 %v744_v31, %v1827_v50 }
 0x284   :  { %v661_v33 = vrot.slane %v660_v46, 1  ;;  %v747_v61 = vadd.f32 %v745_v32, %v742_v49  ;;  %v793_v13 = vpop.permute.xlu1 %792 }
 0x285   :  { %v748_v34 = vadd.f32 %v746_v57, %v743_v53 }
 0x286   :  { %v662_v36 = vadd.f32 %v661_v33, %v660_v46 }
 0x287   :  { %v749_v37 = vadd.f32 %v748_v34, %v747_v61 }
 0x288   :  { %v664_v38 = vmul.f32 0.0625, %v662_v36  ;;  %v689_v17 = vpop.permute.xlu1 %688 }
 0x289   :  { %v750_v39 = vrot.slane %v749_v37, 4 }
 0x28a   :  { %v665_v40 = vsub.f32 %v654_v24, %v664_v38  ;;  %v666_v41 = vsub.f32 %v655_v51, %v664_v38  ;;  %v801_v38 = vld [vmem:[%s1894_s3 + $0x10] sm:$0xff] }
 0x28b   :  { %v751_v42 = vadd.f32 %v750_v39, %v749_v37  ;;  %v800_v37 = vld [vmem:[%s1894_s3 + $0x8] sm:$0xff]  ;;  %v937_v39 = vld [vmem:[%s1895_s4] sm:$0xff] }
 0x28c   :  { %v667_v47 = vmul.f32 %v665_v40, %v665_v40  ;;  %v668_v35 = vmul.f32 %v666_v41, %v666_v41  ;;  %v788_v23 = vpop.permute.xlu1 %787 }
 0x28d   :  { %v752_v48 = vrot.slane %v751_v42, 2 }
 0x28e   :  { %v669_v5 = vadd.f32 %v668_v35, %v667_v47 }
 0x28f   :  { %v753_v52 = vadd.f32 %v752_v48, %v751_v42 }
 0x290   :  { %v670_v10 = vrot.slane %v669_v5, 4  ;;  %v684_v24 = vpop.permute.xlu1 %683 }
 0x291   :  { %v754_v25 = vrot.slane %v753_v52, 1 }
 0x292   :  { %v671_v18 = vadd.f32 %v670_v10, %v669_v5 }
 0x293   :  { %v755_v54 = vadd.f32 %v754_v25, %v753_v52 }
 0x294   :  { %v672_v50 = vrot.slane %v671_v18, 2  ;;  %v701_v28 = vpop.permute.xlu1 %700 }
 0x295   :  { %v756_v55 = vmul.f32 0.0625, %v755_v54 }
 0x296   :  { %v673_v56 = vadd.f32 %v672_v50, %v671_v18 }
 0x297   :  { %v757_v58 = vsub.f32 %v747_v61, %v756_v55  ;;  %v758_v59 = vsub.f32 %v748_v34, %v756_v55 }
 0x298   :  { %v674_v62 = vrot.slane %v673_v56, 1  ;;  %v696_v57 = vpop.permute.xlu1 %695 }
 0x299   :  { %v759_v63 = vmul.f32 %v757_v58, %v757_v58  ;;  %v760_v1 = vmul.f32 %v758_v59, %v758_v59 }
 0x29a   :  { %v675_v2 = vadd.f32 %v674_v62, %v673_v56 }
 0x29b   :  { %v761_v3 = vadd.f32 %v760_v1, %v759_v63  ;;  %v938_v63 = vld [vmem:[%s1895_s4 + $0x8] sm:$0xff]  ;;  %v939_v1 = vld [vmem:[%s1895_s4 + $0x10] sm:$0xff] }
 0x29c   :  { %v676_v4 = vmul.f32 0.0625, %v675_v2  ;;  %v940_v2 = vld [vmem:[%s1895_s4 + $0x18] sm:$0xff]  ;;  %s1402_s4 = smov [#allocation5]  }
 0x29d   :  { %v762_v6 = vrot.slane %v761_v3, 4 }
 0x29e   :  { %v677_v8 = vadd.f32 1e-05, %v676_v4 }
 0x29f   :  { %v763_v9 = vadd.f32 %v762_v6, %v761_v3  ;;  %v1076_v3 = vld [vmem:[%s1898_s7 + $0x40] sm:$0x1f]  ;;  %s1162_s7 = sshll.u32 %s1402_s4, 4  ;;  %s1163_s7 = int_to_ptr.vmem [resolvable:$true] %s1162_s7 }
 0x2a0   :  { %1350 = vrsqrt.f32 %v677_v8  ;;  %1079 = vperm.xlu0 %1335, %v1076_v3   ;;  %s1374_s23 = scalar_lea.vmem %s1163_s7, 128  ;;  %p1379_p6 = scmp.lt.s32.totalorder %s1163_s7, %s1163_s7 }
 0x2a1   :  { %v764_v11 = vrot.slane %v763_v9, 2  ;;  %p1375_p5 = scmp.ne.s32.totalorder %s1163_s7, %s1374_s23  ;;  %p1380_p7 = scmp.lt.s32.totalorder %s1374_s23, %s1374_s23 }
 0x2a3   :  { %v765_v12 = vadd.f32 %v764_v11, %v763_v9  ;;  %p1381_p8 = por %p1380_p7, %p1379_p6 }
 0x2a5   :  { %v766_v14 = vrot.slane %v765_v12, 1  ;;  %p1382_p9 = pnand %p1381_p8, %p1375_p5 }
 0x2a7   :  { %v767_v15 = vadd.f32 %v766_v14, %v765_v12 }
 0x2a9   :  { %v768_v16 = vmul.f32 0.0625, %v767_v15 }
 0x2ab   :  { %v769_v19 = vadd.f32 1e-05, %v768_v16 }
 0x2ad   :  { %v1351_v20 = vpop.eup %1350  ;;  %1352 = vrsqrt.f32 %v769_v19 }
 0x2ae   :  { %v680_v21 = vmul.f32 %v1351_v20, %v666_v41  ;;  %v679_v22 = vmul.f32 %v1351_v20, %v665_v40  ;;  %v825_v40 = vpop.permute.xlu1 %824 }
 0x2b0   :  { %v692_v45 = vmul.f32 %v689_v17, %v680_v21  ;;  %v691_v49 = vmul.f32 %v684_v24, %v679_v22 }
 0x2b2   :  { %v704_v32 = vadd.f32 %v701_v28, %v692_v45  ;;  %v703_v61 = vadd.f32 %v696_v57, %v691_v49  ;;  %v820_v41 = vpop.permute.xlu1 %819 }
 0x2b4   :  { %v706_v34 = vmax.f32 %v704_v32, 0.0  ;;  %v705_v36 = vmax.f32 %v703_v61, 0.0 }
 0x2ba   :  { %v1353_v51 = vpop.eup %1352 }
 0x2bb   :  { %v772_v26 = vmul.f32 %v1353_v51, %v758_v59  ;;  %v771_v27 = vmul.f32 %v1353_v51, %v757_v58 }
 0x2bd   :  { %v784_v29 = vmul.f32 %v781_v60, %v772_v26  ;;  %v783_v30 = vmul.f32 %v776_v7, %v771_v27  ;;  %v1075_v26 = vld [vmem:[#allocation2] sm:$0x1f] }
 0x2bf   :  { %v796_v31 = vadd.f32 %v793_v13, %v784_v29  ;;  %v795_v46 = vadd.f32 %v788_v23, %v783_v30 }
 0x2c1   :  { %v798_v53 = vmax.f32 %v796_v31, 0.0  ;;  %v797_v33 = vmax.f32 %v795_v46, 0.0 }
 0x2c3   :  { %1238 = vmatprep.subr.mxu0 %v798_v53 }
 0x2c4   :  { %1239 = vmatpush3.msra.mxu0 %v798_v53 }
 0x2c5   :  { %1240 = vmatprep.subr.mxu0 %v797_v33 }
 0x2c6   :  { %1241 = vmatpush3.msra.mxu0 %v797_v33 }
 0x2c7   :  { %1242 = vmatprep.subr.mxu0 %v706_v34 }
 0x2c8   :  { %1243 = vmatpush3.msra.mxu0 %v706_v34 }
 0x2c9   :  { %1244 = vmatprep.subr.mxu0 %v705_v36 }
 0x2ca   :  { %1245 = vmatpush3.msra.mxu0 %v705_v36 }
 0x2cb   :  { %1246 = vmatprep.subr.mxu0 %v1791_v44 }
 0x2cc   :  { %1247 = vmatpush3.msra.mxu0 %v1791_v44  ;;  %v802_v44 = vld [vmem:[%s1894_s3 + $0x18] sm:$0xff] }
 0x2cd   :  { %1248 = vmatprep.subr.mxu0 %v1789_v43 }
 0x2ce   :  { %1249 = vmatpush3.msra.mxu0 %v1789_v43  ;;  %v815_v43 = vpop.permute.xlu1 %814 }
 0x2cf   :  { %1251 = vmatmul.mubr.msk.f32.vlgmr.msra.gmra.mxu0 %vm827_vm3, %v800_v37 }
 0x2d0   :  { %1253 = vmatprep.mubr.msk.f32.mxu0 %vm827_vm3, %v801_v38 }
 0x2d2   :  { %v810_v52 = vpop.permute.xlu1 %809 }
 0x2d3   :  { %1254 = vmatmul.mubr.msk.f32.gmra.mxu0 %vm827_vm3, %v802_v44 }
 0x2d4   :  { %1264 = vmatprep.mubr.msk.f32.mxu0 %vm965_vm4, %v937_v39 }
 0x2d6   :  { %v963_v4 = vpop.permute.xlu1 %962 }
 0x2da   :  { %v958_v6 = vpop.permute.xlu1 %957 }
 0x2de   :  { %v953_v7 = vpop.permute.xlu1 %952 }
 0x2e2   :  { %v948_v14 = vpop.permute.xlu1 %947 }
 0x31b   :  { %v1080_v28 = vpop.permute.xlu0 %1079 }
 0x38f   :  { %v1252_v42 = vpop.f32.mrf.mxu0 }
 0x390   :  { %v912_v48 = vadd.f32 %v1252_v42, %v815_v43 }
 0x391   :  { %v906_v47 = vpop.f32.mrf.mxu0 }
 0x392   :  { %v907_v25 = vadd.f32 %v906_v47, %v810_v52  ;;  %v930_v50 = vmul.f32 0.01, %v912_v48  ;;  %vm926_vm7 = vcmp.ge.f32.partialorder %v912_v48, 0.0 }
 0x393   :  { %v1255_v35 = vpop.f32.mrf.mxu0 }
 0x394   :  { %v922_v5 = vadd.f32 %v1255_v35, %v825_v40  ;;  %v929_v58 = vmul.f32 0.01, %v907_v25  ;;  %vm925_vm8 = vcmp.ge.f32.partialorder %v907_v25, 0.0  ;;  %v934_v60 = vsel %vm926_vm7, %v912_v48, %v930_v50 }
 0x395   :  { %v916_v10 = vpop.f32.mrf.mxu0 }
 0x396   :  { %v932_v18 = vmul.f32 0.01, %v922_v5  ;;  %v917_v54 = vadd.f32 %v916_v10, %v820_v41  ;;  %vm928_vm5 = vcmp.ge.f32.partialorder %v922_v5, 0.0  ;;  %v933_v62 = vsel %vm925_vm8, %v907_v25, %v929_v58 }
 0x398   :  { %v931_v55 = vmul.f32 0.01, %v917_v54  ;;  %v936_v56 = vsel %vm928_vm5, %v922_v5, %v932_v18  ;;  %vm927_vm6 = vcmp.ge.f32.partialorder %v917_v54, 0.0 }
 0x399   :  { %1256 = vmatprep.subr.mxu0 %v936_v56 }
 0x39a   :  { %1257 = vmatpush3.msra.mxu0 %v936_v56  ;;  %v935_v59 = vsel %vm927_vm6, %v917_v54, %v931_v55 }
 0x39b   :  { %1258 = vmatprep.subr.mxu0 %v935_v59 }
 0x39c   :  { %1259 = vmatpush3.msra.mxu0 %v935_v59 }
 0x39d   :  { %1260 = vmatprep.subr.mxu0 %v934_v60 }
 0x39e   :  { %1261 = vmatpush3.msra.mxu0 %v934_v60 }
 0x39f   :  { %1262 = vmatprep.subr.mxu0 %v933_v62 }
 0x3a0   :  { %1263 = vmatpush3.msra.mxu0 %v933_v62 }
 0x3a1   :  { %1265 = vmatmul.mubr.msk.f32.vlgmr.msra.gmra.mxu0 %vm965_vm4, %v938_v63  ;;  %1270 = vmatprep.subr.mxu0 %v1399_v0 }
 0x3a2   :  { %1267 = vmatprep.mubr.msk.f32.mxu0 %vm965_vm4, %v939_v1 }
 0x3a5   :  { %1268 = vmatmul.mubr.msk.f32.gmra.mxu0 %vm965_vm4, %v940_v2 }
 0x3a6   :  { %1278 = vmatprep.mubr.msk.f32.mxu0 %vm1401_vm9, %v1399_v0 }
 0x461   :  { %v1266_v8 = vpop.f32.mrf.mxu0 }
 0x462   :  { %v1050_v12 = vadd.f32 %v1266_v8, %v953_v7 }
 0x463   :  { %v1044_v9 = vpop.f32.mrf.mxu0 }
 0x464   :  { %v1045_v16 = vadd.f32 %v1044_v9, %v948_v14  ;;  %v1068_v20 = vmul.f32 0.01, %v1050_v12  ;;  %vm1064_vm12 = vcmp.ge.f32.partialorder %v1050_v12, 0.0 }
 0x465   :  { %v1269_v11 = vpop.f32.mrf.mxu0 }
 0x466   :  { %v1060_v13 = vadd.f32 %v1269_v11, %v963_v4  ;;  %v1067_v23 = vmul.f32 0.01, %v1045_v16  ;;  %vm1063_vm13 = vcmp.ge.f32.partialorder %v1045_v16, 0.0  ;;  %v1072_v51 = vsel %vm1064_vm12, %v1050_v12, %v1068_v20 }
 0x467   :  { %v1054_v15 = vpop.f32.mrf.mxu0 }
 0x468   :  { %vm1066_vm10 = vcmp.ge.f32.partialorder %v1060_v13, 0.0  ;;  %v1070_v17 = vmul.f32 0.01, %v1060_v13  ;;  %v1055_v19 = vadd.f32 %v1054_v15, %v958_v6  ;;  %v1071_v27 = vsel %vm1063_vm13, %v1045_v16, %v1067_v23 }
 0x46a   :  { %vm1065_vm11 = vcmp.ge.f32.partialorder %v1055_v19, 0.0  ;;  %v1069_v21 = vmul.f32 0.01, %v1055_v19  ;;  %v1074_v22 = vsel %vm1066_vm10, %v1060_v13, %v1070_v17 }
 0x46b   :  { %1271 = vmatpush3.msra.mxu0 %v1074_v22 }
 0x46c   :  { %1272 = vmatprep.subr.mxu0 %v1399_v0  ;;  %v1073_v24 = vsel %vm1065_vm11, %v1055_v19, %v1069_v21 }
 0x46d   :  { %1273 = vmatpush3.msra.mxu0 %v1073_v24 }
 0x46e   :  { %1274 = vmatprep.subr.mxu0 %v1399_v0 }
 0x46f   :  { %1275 = vmatpush3.msra.mxu0 %v1072_v51 }
 0x470   :  { %1276 = vmatprep.subr.mxu0 %v1399_v0 }
 0x471   :  { %1277 = vmatpush3.msra.mxu0 %v1071_v27 }
 0x472   :  { %1279 = vmatmul.mubr.msk.f32.vlgmr.msra.gmra.mxu0 %vm965_vm4, %v1075_v26 }
 0x532   :  { %v1151_v29 = vpop.f32.mrf.mxu0 }
 0x533   :  { %v1152_v30 = vadd.f32 %v1151_v29, %v1080_v28 }
 0x534   :  { %v1280_v45 = vpop.f32.mrf.mxu0 }
 0x535   :  { %1155 = vst [vmem:[#allocation5] sm:$0x1f] %v1152_v30 }
 0x536   :  { %1385 = shalt.err (!%p1382_p9)
}
 0x537   :  { %1165 = dma.vmem_to_hbm [thread:$0]  %s1163_s7, 128, %s1899_s8, [#allocation4]  }
 0x538   :  { %1396 = dma.done.wait [#allocation4], 128  }
 0x539   :  { %1397 = vsyncadd [#allocation4], 4294967168 }
 0x53a   :  { %1169 = vsyncpa [#allocation3], 1 }
 0x53b   :  { %1170 = vsyncpa [#allocation4], 1 }

</bundles_post_ra>
